<compile_context>
chip_gen: v7x
topology: tpu7x:2x2x1
jax: 0.10.0
libtpu: 0.0.40
codegen_flags: <defaults>
</compile_context>

<pallas_src>
import jax
import jax.numpy as jnp
from jax.experimental import pallas as pl
from jax.experimental.pallas import tpu as pltpu


# ------------------------------- kernel ------------------------------------ #

def _cube_kernel(d_ref, o_ref):
    # Elementwise hot path: d**3 = (d*d)*d -> 2 VPU multiplies per vreg.
    # Purely HBM-bound (1 vld, 2 vmul, 1 vst per vreg).
    d = d_ref[...]
    o_ref[...] = d * d * d


# ------------------------------- wrapper ------------------------------------ #

_MIN_PALLAS_BYTES = 256 * 1024          # below this, plain jnp is cheaper
_TARGET_BLOCK_BYTES = 4 * 1024 * 1024   # ~4 MiB per block per buffer
_VMEM_LIMIT_BYTES = 32 * 1024 * 1024    # 4 MiB * 4 buffers = 16 MiB << 32 MiB


def third_order_param_forward(data: jax.Array) -> jax.Array:
    """Compute data**3 elementwise with a Pallas TPU kernel.

    Accepts any shape/size; internally streams the data as a lane-dense
    (rows, lane) slab in ~4 MiB double-buffered blocks.
    """
    orig_shape = data.shape
    dtype = data.dtype
    itemsize = jnp.dtype(dtype).itemsize
    total = int(data.size)

    # Small-parameter fallback: launch cost + plumbing dominates; let XLA fuse.
    if total * itemsize < _MIN_PALLAS_BYTES or total == 0:
        return data * data * data

    flat = data.reshape(-1)

    # Lane-dense layout: widest lane width (multiple of 128) that divides the
    # element count -> unmasked `vst`, contiguous DMA, and NO pad/slice copies.
    pad = 0
    for lane in (512, 256, 128):
        if total % lane == 0:
            break
    else:
        lane = 512
        pad = (-total) % lane           # only truly ragged totals pay a pad

    if pad:
        flat = jnp.pad(flat, (0, pad))
    padded_total = total + pad
    rows = padded_total // lane

    # dtype-aware sublane granularity: 8 (f32), 16 (bf16/f16), 32 (int8/fp8).
    sublane = max(8, 32 // itemsize)

    # Block rows: multiple of `sublane`, block bytes <= ~4 MiB.
    target_rows = max(sublane, _TARGET_BLOCK_BYTES // (lane * itemsize))
    target_rows = (target_rows // sublane) * sublane

    # Keep at least 2 grid steps when there is enough work, so a "parallel"
    # grid axis can shard across the two TensorCores on v7x.
    if rows >= 2 * sublane:
        half_rows = pl.cdiv(pl.cdiv(rows, 2), sublane) * sublane
        block_rows = min(target_rows, half_rows)
    else:
        block_rows = sublane
    block_rows = max(sublane, min(block_rows, pl.cdiv(rows, sublane) * sublane))

    grid_steps = pl.cdiv(rows, block_rows)   # ragged last block is masked
    x2d = flat.reshape(rows, lane)

    out2d = pl.pallas_call(
        _cube_kernel,
        out_shape=jax.ShapeDtypeStruct((rows, lane), dtype),
        grid=(grid_steps,),
        in_specs=[pl.BlockSpec((block_rows, lane), lambda i: (i, 0))],
        out_specs=pl.BlockSpec((block_rows, lane), lambda i: (i, 0)),
        compiler_params=pltpu.CompilerParams(
            dimension_semantics=("parallel",),
            vmem_limit_bytes=_VMEM_LIMIT_BYTES,
        ),
        cost_estimate=pl.CostEstimate(
            flops=2 * padded_total,
            transcendentals=0,
            bytes_accessed=2 * padded_total * itemsize,
        ),
    )(x2d)

    out = out2d.reshape(-1)
    if pad:
        out = out[:total]
    return out.reshape(orig_shape)


# ------------------------------ module mirror ------------------------------- #

class ThirdOrderParam:
    """JAX mirror of the PyTorch `third_order_param` (parameter-only forward)."""

    def __init__(self, real_val: jax.Array):
        # Parameter init: data = real_val ** (1/3). Dtype is preserved.
        # Note: like torch.pow, this is NaN for negative real_val.
        self.data = jnp.power(jnp.asarray(real_val), 1.0 / 3.0)

    def __call__(self) -> jax.Array:
        return third_order_param_forward(self.data)

    def get_order(self) -> int:
        return 3


# ---------------------------------- demo ------------------------------------ #

if __name__ == "__main__":
    key = jax.random.PRNGKey(0)
    k1, k2, k3, k4 = jax.random.split(key, 4)

    # 1) Aligned f32 parameter large enough to take the Pallas path
    #    (512*1024*4B = 2 MiB; total % 512 == 0 -> zero-copy slab, grid of 2).
    real_val = jax.random.uniform(k1, (512, 1024), dtype=jnp.float32,
                                  minval=0.1, maxval=2.0)
    module = ThirdOrderParam(real_val)
    out = jax.block_until_ready(module())
    ref = module.data * module.data * module.data
    assert out.shape == (512, 1024) and out.dtype == jnp.float32
    assert jnp.allclose(out, ref, rtol=1e-5, atol=1e-6), "mismatch vs reference"
    assert jnp.allclose(out, real_val, rtol=1e-4, atol=1e-5), \
        "data**3 should recover real_val"

    # 2) Awkward, non-128-divisible shape (exercises the pad + ragged-block path).
    real_val2 = jax.random.uniform(k2, (777, 333), dtype=jnp.float32,
                                   minval=0.1, maxval=2.0)
    module2 = ThirdOrderParam(real_val2)
    out2 = jax.block_until_ready(module2())
    ref2 = module2.data * module2.data * module2.data
    assert out2.shape == (777, 333)
    assert jnp.allclose(out2, ref2, rtol=1e-5, atol=1e-6)
    assert jnp.allclose(out2, real_val2, rtol=1e-4, atol=1e-5)

    # 3) bf16 parameter (dtype-aware sublane=16 path, dtype preserved).
    real_val3 = jax.random.uniform(k3, (512, 1024), dtype=jnp.float32,
                                   minval=0.1, maxval=2.0).astype(jnp.bfloat16)
    module3 = ThirdOrderParam(real_val3)
    out3 = jax.block_until_ready(module3())
    assert out3.dtype == jnp.bfloat16
    ref3 = module3.data * module3.data * module3.data
    assert jnp.allclose(out3.astype(jnp.float32), ref3.astype(jnp.float32),
                        rtol=2e-2, atol=1e-3)

    # 4) Small parameters (32x128 and 7x50) take the fused-jnp fallback.
    for shape in [(32, 128), (7, 50)]:
        rv = jax.random.uniform(k4, shape, dtype=jnp.float32,
                                minval=0.1, maxval=2.0)
        m = ThirdOrderParam(rv)
        o = jax.block_until_ready(m())
        assert o.shape == shape
        assert jnp.allclose(o, m.data * m.data * m.data, rtol=1e-5, atol=1e-6)
        assert jnp.allclose(o, rv, rtol=1e-4, atol=1e-5)

    print("KERNEL_OK")
</pallas_src>

<mosaic_0001>
module attributes {stable_mosaic.version = 11 : i64} {
  func.func @_cube_kernel(%arg0: i32, %arg1: memref<512x512xf32, #tpu.memory_space<vmem>>, %arg2: memref<512x512xf32, #tpu.memory_space<vmem>>) attributes {dimension_semantics = [#tpu.dimension_semantics<parallel>], iteration_bounds = array<i64: 2>, scalar_prefetch = 0 : i64, scratch_operands = 0 : i64, tpu.core_type = #tpu.core_type<tc>, window_params = [{transform_indices = @transform_0, window_bounds = array<i64: 512, 512>}, {transform_indices = @transform_1, window_bounds = array<i64: 512, 512>}]} {
    %c0 = arith.constant 0 : index
    %c0_0 = arith.constant 0 : index
    %0 = vector.load %arg1[%c0, %c0_0] : memref<512x512xf32, #tpu.memory_space<vmem>>, vector<512x512xf32>
    %1 = arith.mulf %0, %0 : vector<512x512xf32>
    %2 = arith.mulf %1, %0 : vector<512x512xf32>
    %c0_1 = arith.constant 0 : index
    %c0_2 = arith.constant 0 : index
    %3 = vector.load %arg2[%c0_1, %c0_2] : memref<512x512xf32, #tpu.memory_space<vmem>>, vector<512x512xf32>
    tpu.vector_store %arg2[%c0_1, %c0_2], %2 {strides = array<i32>} : memref<512x512xf32, #tpu.memory_space<vmem>>, vector<512x512xf32>,
    return
  }
  func.func @transform_0(%arg0: i32) -> (i32, i32) {
    %c0_i32 = arith.constant 0 : i32
    %c0_i32_0 = arith.constant 0 : i32
    return %arg0, %c0_i32 : i32, i32
  }
  func.func @transform_1(%arg0: i32) -> (i32, i32) {
    %c0_i32 = arith.constant 0 : i32
    %c0_i32_0 = arith.constant 0 : i32
    return %arg0, %c0_i32 : i32, i32
  }
}

</mosaic_0001>

<bundles_post_ra>
// kernel: tpu_custom_call.1
= control target key start
LH: loop header
LB: loop body
LE: loop exit
PB: predicated region body
PF: predicated region fallthrough
CT: control target
= control target key end

     0   :  { %6 = vsyncpa [#allocation3], 0  ;;  %s2117_s0 = inlined_call_operand.hbm [shape: f32[1024,512], index: 0, kind: input, shape index: {}]   ;;  %s2118_s1 = inlined_call_operand.hbm [shape: f32[1024,512], index: 1, kind: output, shape index: {}]  }
   0x1   :  { %8 = vsyncpa [#allocation3 + $0x1], 0 }
   0x2   :  { %9 = vsyncpa [#allocation4], 0 }
   0x3   :  { %11 = vsyncpa [#allocation4 + $0x1], 0  ;;  %s1434_s6 = smov 0   ;;  %s1436_s7 = smov 0  }
   0x4   :  { %s1438_s8 = smov 0   ;;  %s1440_s9 = smov 0  }
   0x5 LB: > { %s1455_s10 = sadd.s32 4294967295, %s1416_s9   ;;  %s1250_s11 = sadd.s32 4294967294, %s1416_s9   ;;  %s1416_s9 = sphi %s1440_s9, %s2131_s9   ;;  %s1412_s8 = sphi %s1438_s8, %s2130_s8   ;;  %s1408_s7 = sphi %s1436_s7, %s2129_s7   ;;  %s1404_s6 = sphi %s1434_s6, %s2128_s6  }
   0x6   : > { %s1459_s12 = sadd.s32 1, %s1416_s9   ;;  %s24_s13 = sadd.s32 1, %s1412_s8 }
   0x7   : > { %s21_s14 = ssub.s32 %s1416_s9, %s1459_s12  ;;  %p31_p0 = scmp.ne.s32.totalorder %s1412_s8, %s1408_s7 }
   0x8   : > { %p22_p1 = scmp.eq.s32.totalorder %s21_s14, 0  ;;  %p32_p2 = scmp.eq.s32.totalorder %s1416_s9, 0 }
   0x9   : > { %p37_p3 = scmp.ne.s32.totalorder %s1408_s7, %s1404_s6  ;;  %p38_p4 = scmp.eq.s32.totalorder %s1455_s10, 0 }
   0xa   : > { %s1471_s15 = scalar_select %p22_p1, %s1412_s8, %s24_s13  }
   0xb   : > { %p1473_p5 = por %p32_p2, %p31_p0  ;;  %p1477_p6 = por %p38_p4, %p37_p3 }
   0xc   : > { %p61_p7 = scmp.eq.s32.totalorder %s1455_s10, 1  ;;  %p67_p8 = scmp.eq.s32.totalorder %s1250_s11, 1 }
   0xd   : > { %p1282_p10 = scmp.lt.s32.totalorder %s1416_s9, 2  ;;  %s87_s20 = sand.u32 1, %s1412_s8  }
   0xe   : > { %p1484_p11 = por %p61_p7, %p31_p0  ;;  %p1488_p12 = por %p67_p8, %p37_p3 }
   0xf   : > { %s1267_s21 = sshll.u32 %s1416_s9, 15  ;;  %s1253_s22 = sshll.u32 %s87_s20, 11 }
  0x10   : > { %s2122_s18 = scalar_select %p1484_p11, 1, 0 }
  0x11   : > { %s2123_s19 = scalar_select %p1488_p12, 1, 0 }
  0x12   : > { %s1497_s25 = scalar_lea.hbm %s2117_s0, %s1267_s21  ;;  %s91_s26 = scalar_lea.vmem [#allocation2], %s1253_s22 }
  0x13   : > { %s99_s27 = sshll.u32 %s91_s26, 4  ;;  %p1501_p13 = pnand %p1282_p10, %p1473_p5  ;;  %s1505_s27 = int_to_ptr.vmem [resolvable:$true] %s99_s27 }
  0x14   : > { %s1507_s29 = scalar_lea.sflag [#allocation3], %s87_s20  ;;  %s1320_s30 = scalar_lea.hbm %s1497_s25, 32768 }
  0x15   : > { %p1321_p0 = scmp.ne.s32.totalorder %s1497_s25, %s1320_s30  ;;  %p1322_p1 = pneg %p1501_p13 }
  0x16   : > { %s1325_s4 = scalar_lea.hbm %s2117_s0, 65536  ;;  %p1326_p4 = scmp.lt.u32.totalorder %s1497_s25, %s2117_s0 }
  0x17   : > { %p1323_p2 = pnand %p1322_p1, %p1321_p0  ;;  %p1327_p5 = scmp.lt.u32.totalorder %s1325_s4, %s1320_s30 }
  0x18   : > { %p1329_p8 = scmp.lt.u32.totalorder %s1320_s30, %s1497_s25 }
  0x19   : > { %p1324_p3 = pneg %p1323_p2  ;;  %p1328_p7 = por %p1327_p5, %p1326_p4 }
  0x1b   : > { %p1330_p10 = por %p1329_p8, %p1328_p7 }
  0x1d   : > { %p1331_p9 = pnand %p1330_p10, %p1324_p3 }
  0x1f   : > { %1334 = shalt.err (!%p1331_p9)
}
  0x20   : > { %s1335_s13 = scalar_lea.vmem %s1505_s27, 32768  ;;  %s1418_s14 = smov [#allocation2]  }
  0x21   : > { %p1336_p0 = scmp.ne.s32.totalorder %s1505_s27, %s1335_s13  ;;  %s1340_s16 = sshll.u32 %s1418_s14, 4  ;;  %s1341_s16 = int_to_ptr.vmem [resolvable:$false] %s1340_s16 }
  0x22   : > { %s1342_s20 = scalar_lea.vmem %s1341_s16, 65536  ;;  %p1343_p11 = scmp.lt.s32.totalorder %s1505_s27, %s1341_s16 }
  0x23   : > { %p1338_p2 = pnand %p1336_p0, %p1322_p1  ;;  %p1344_p4 = scmp.lt.s32.totalorder %s1342_s20, %s1335_s13 }
  0x25   : > { %p1339_p12 = pneg %p1338_p2  ;;  %p1345_p5 = por %p1344_p4, %p1343_p11 }
  0x27   : > { %p1346_p7 = pnand %p1345_p5, %p1339_p12 }
  0x29   : > { %1349 = shalt.err (!%p1346_p7)
}
  0x2a   : > { %s1419_s21 = smov 512   ;;  %s1420_s22 = smov 32  }
  0x2b   : > { %1277 = dma.hbm_to_vmem [thread:$0]  (!%p1501_p13), %s1497_s25, 32768, %s1505_s27, %s1507_s29, %s1419_s21, %s1419_s21, %s1420_s22  }
  0x2c   : > { %p1257_p9 = scmp.ge.s32.totalorder %s1416_s9, 1  ;;  %p107_p1 = scmp.lt.s32.totalorder %s1416_s9, 3 }
  0x2e   : > { %p108_p3 = pnand %p1257_p9, %p107_p1 }
  0x2f   : > { %s1538_s23 = sand.u32 (!%p108_p3), 1, %s1408_s7  }
  0x30   : > { %111 = sbr.rel (%p108_p3) target bundleno = 228 (0xe4), region = 24  ;;  %s1258_s24 = sshll.u32 (!%p108_p3), %s1538_s23, 11 }
  0x31   : > { %s114_s26 = scalar_lea.sflag (!%p108_p3), [#allocation3], %s1538_s23  ;;  %s1544_s30 = scalar_lea.vmem (!%p108_p3), [#allocation2], %s1258_s24 }
  0x37   : > { %1395 = dma.done.wait (%p1477_p6), %s114_s26, 32768  }
  0x38   : > { %1397 = vsyncadd (%p1477_p6), %s114_s26, 4294934528  ;;  %v138_v0 = vld [vmem:[%s1544_s30] sm:$0xff]  ;;  %v139_v1 = vld [vmem:[%s1544_s30 + $0x8] sm:$0xff]  ;;  %s1567_s17 = scalar_lea.vmem [#allocation5], %s1258_s24  ;;  %s1269_s25 = sshll.u32 %s1455_s10, 15 }
  0x39   : > { %v140_v2 = vld [vmem:[%s1544_s30 + $0x10] sm:$0xff]  ;;  %v394_v3 = vmul.f32 %v138_v0, %v138_v0  ;;  %v395_v4 = vmul.f32 %v139_v1, %v139_v1  ;;  %v141_v6 = vld [vmem:[%s1544_s30 + $0x18] sm:$0xff]  ;;  %v142_v7 = vld [vmem:[%s1544_s30 + $0x20] sm:$0xff]  ;;  %s1177_s27 = sshll.u32 %s1567_s17, 4  ;;  %s2066_s29 = scalar_lea.hbm %s2118_s1, %s1269_s25  ;;  %s2068_s27 = int_to_ptr.vmem [resolvable:$true] %s1177_s27 }
  0x3a   : > { %v396_v5 = vmul.f32 %v140_v2, %v140_v2  ;;  %v143_v8 = vld [vmem:[%s1544_s30 + $0x28] sm:$0xff]  ;;  %v397_v9 = vmul.f32 %v141_v6, %v141_v6  ;;  %v398_v10 = vmul.f32 %v142_v7, %v142_v7  ;;  %v144_v12 = vld [vmem:[%s1544_s30 + $0x30] sm:$0xff]  ;;  %v145_v13 = vld [vmem:[%s1544_s30 + $0x38] sm:$0xff]  ;;  %s1163_s2 = scalar_lea.sflag [#allocation4], %s1538_s23  ;;  %s1350_s3 = scalar_lea.vmem %s2068_s27, 32768 }
  0x3b   : > { %v399_v11 = vmul.f32 %v143_v8, %v143_v8  ;;  %v146_v14 = vld [vmem:[%s1544_s30 + $0x40] sm:$0xff]  ;;  %v650_v15 = vmul.f32 %v394_v3, %v138_v0  ;;  %v651_v16 = vmul.f32 %v395_v4, %v139_v1  ;;  %v400_v18 = vmul.f32 %v144_v12, %v144_v12  ;;  %v147_v19 = vld [vmem:[%s1544_s30 + $0x48] sm:$0xff]  ;;  %v148_v20 = vld [vmem:[%s1544_s30 + $0x50] sm:$0xff]  ;;  %p1351_p6 = scmp.ne.s32.totalorder %s2068_s27, %s1350_s3  ;;  %p2125_p11 = scmp.ne.s32.totalorder %s2122_s18, 0 }
  0x3c   : > { %v652_v17 = vmul.f32 %v396_v5, %v140_v2  ;;  %v149_v21 = vld [vmem:[%s1544_s30 + $0x58] sm:$0xff]  ;;  %v653_v22 = vmul.f32 %v397_v9, %v141_v6  ;;  %v654_v23 = vmul.f32 %v398_v10, %v142_v7  ;;  %v401_v25 = vmul.f32 %v145_v13, %v145_v13  ;;  %v150_v26 = vld [vmem:[%s1544_s30 + $0x60] sm:$0xff]  ;;  %v151_v27 = vld [vmem:[%s1544_s30 + $0x68] sm:$0xff]  ;;  %s1421_s4 = smov [#allocation5]  }
  0x3d   : > { %v655_v24 = vmul.f32 %v399_v11, %v143_v8  ;;  %v152_v28 = vld [vmem:[%s1544_s30 + $0x70] sm:$0xff]  ;;  %906 = vst [vmem:[%s1567_s17] sm:$0xff] %v650_v15  ;;  %907 = vst [vmem:[%s1567_s17 + $0x8] sm:$0xff] %v651_v16  ;;  %v656_v29 = vmul.f32 %v400_v18, %v144_v12  ;;  %v402_v30 = vmul.f32 %v146_v14, %v146_v14  ;;  %v153_v33 = vld [vmem:[%s1544_s30 + $0x78] sm:$0xff]  ;;  %p1352_p12 = pnand %p1351_p6, %p2125_p11  ;;  %s1354_s5 = sshll.u32 %s1421_s4, 4  ;;  %s1355_s5 = int_to_ptr.vmem [resolvable:$false] %s1354_s5 }
  0x3e   : > { %908 = vst [vmem:[%s1567_s17 + $0x10] sm:$0xff] %v652_v17  ;;  %v403_v31 = vmul.f32 %v147_v19, %v147_v19  ;;  %v404_v32 = vmul.f32 %v148_v20, %v148_v20  ;;  %909 = vst [vmem:[%s1567_s17 + $0x18] sm:$0xff] %v653_v22  ;;  %v657_v34 = vmul.f32 %v401_v25, %v145_v13  ;;  %v154_v38 = vld [vmem:[%s1544_s30 + $0x80] sm:$0xff]  ;;  %v155_v39 = vld [vmem:[%s1544_s30 + $0x88] sm:$0xff]  ;;  %s1356_s11 = scalar_lea.vmem %s1355_s5, 65536  ;;  %p1357_p8 = scmp.lt.s32.totalorder %s2068_s27, %s1355_s5 }
  0x3f   : > { %910 = vst [vmem:[%s1567_s17 + $0x20] sm:$0xff] %v654_v23  ;;  %911 = vst [vmem:[%s1567_s17 + $0x28] sm:$0xff] %v655_v24  ;;  %v405_v35 = vmul.f32 %v149_v21, %v149_v21  ;;  %v406_v36 = vmul.f32 %v150_v26, %v150_v26  ;;  %v407_v37 = vmul.f32 %v151_v27, %v151_v27  ;;  %v156_v40 = vld [vmem:[%s1544_s30 + $0x90] sm:$0xff]  ;;  %v157_v45 = vld [vmem:[%s1544_s30 + $0x98] sm:$0xff]  ;;  %p1353_p13 = pneg %p1352_p12  ;;  %p1358_p10 = scmp.lt.s32.totalorder %s1356_s11, %s1350_s3 }
  0x40   : > { %912 = vst [vmem:[%s1567_s17 + $0x30] sm:$0xff] %v656_v29  ;;  %v658_v41 = vmul.f32 %v402_v30, %v146_v14  ;;  %v659_v42 = vmul.f32 %v403_v31, %v147_v19  ;;  %v660_v43 = vmul.f32 %v404_v32, %v148_v20  ;;  %v408_v44 = vmul.f32 %v152_v28, %v152_v28  ;;  %v158_v46 = vld [vmem:[%s1544_s30 + $0xa0] sm:$0xff]  ;;  %v159_v47 = vld [vmem:[%s1544_s30 + $0xa8] sm:$0xff]  ;;  %v160_v52 = vld [vmem:[%s1544_s30 + $0xb0] sm:$0xff] }
  0x41   : > { %913 = vst [vmem:[%s1567_s17 + $0x38] sm:$0xff] %v657_v34  ;;  %v661_v48 = vmul.f32 %v405_v35, %v149_v21  ;;  %v662_v49 = vmul.f32 %v406_v36, %v150_v26  ;;  %v663_v50 = vmul.f32 %v407_v37, %v151_v27  ;;  %v409_v51 = vmul.f32 %v153_v33, %v153_v33  ;;  %v161_v57 = vld [vmem:[%s1544_s30 + $0xb8] sm:$0xff]  ;;  %v162_v62 = vld [vmem:[%s1544_s30 + $0xc0] sm:$0xff]  ;;  %v163_v63 = vld [vmem:[%s1544_s30 + $0xc8] sm:$0xff]  ;;  %p1359_p0 = por %p1358_p10, %p1357_p8 }
  0x42   : > { %914 = vst [vmem:[%s1567_s17 + $0x40] sm:$0xff] %v658_v41  ;;  %915 = vst [vmem:[%s1567_s17 + $0x48] sm:$0xff] %v659_v42  ;;  %v664_v53 = vmul.f32 %v408_v44, %v152_v28  ;;  %v410_v54 = vmul.f32 %v154_v38, %v154_v38  ;;  %v411_v55 = vmul.f32 %v155_v39, %v155_v39  ;;  %v164_v0 = vld [vmem:[%s1544_s30 + $0xd0] sm:$0xff]  ;;  %v165_v5 = vld [vmem:[%s1544_s30 + $0xd8] sm:$0xff] }
  0x43   : > { %916 = vst [vmem:[%s1567_s17 + $0x50] sm:$0xff] %v660_v43  ;;  %v412_v56 = vmul.f32 %v156_v40, %v156_v40  ;;  %917 = vst [vmem:[%s1567_s17 + $0x58] sm:$0xff] %v661_v48  ;;  %v665_v58 = vmul.f32 %v409_v51, %v153_v33  ;;  %v413_v59 = vmul.f32 %v157_v45, %v157_v45  ;;  %v166_v6 = vld [vmem:[%s1544_s30 + $0xe0] sm:$0xff]  ;;  %v167_v7 = vld [vmem:[%s1544_s30 + $0xe8] sm:$0xff]  ;;  %p1360_p2 = pnand %p1359_p0, %p1353_p13 }
  0x44   : > { %918 = vst [vmem:[%s1567_s17 + $0x60] sm:$0xff] %v662_v49  ;;  %919 = vst [vmem:[%s1567_s17 + $0x68] sm:$0xff] %v663_v50  ;;  %v414_v60 = vmul.f32 %v158_v46, %v158_v46  ;;  %v415_v61 = vmul.f32 %v159_v47, %v159_v47  ;;  %v666_v1 = vmul.f32 %v410_v54, %v154_v38  ;;  %v168_v12 = vld [vmem:[%s1544_s30 + $0xf0] sm:$0xff]  ;;  %v169_v17 = vld [vmem:[%s1544_s30 + $0xf8] sm:$0xff] }
  0x45   : > { %920 = vst [vmem:[%s1567_s17 + $0x70] sm:$0xff] %v664_v53  ;;  %v667_v2 = vmul.f32 %v411_v55, %v155_v39  ;;  %v668_v3 = vmul.f32 %v412_v56, %v156_v40  ;;  %v416_v4 = vmul.f32 %v160_v52, %v160_v52  ;;  %921 = vst [vmem:[%s1567_s17 + $0x78] sm:$0xff] %v665_v58  ;;  %v170_v22 = vld [vmem:[%s1544_s30 + $0x100] sm:$0xff]  ;;  %v171_v23 = vld [vmem:[%s1544_s30 + $0x108] sm:$0xff] }
  0x46   : > { %v669_v8 = vmul.f32 %v413_v59, %v157_v45  ;;  %v670_v9 = vmul.f32 %v414_v60, %v158_v46  ;;  %v671_v10 = vmul.f32 %v415_v61, %v159_v47  ;;  %v417_v11 = vmul.f32 %v161_v57, %v161_v57  ;;  %922 = vst [vmem:[%s1567_s17 + $0x80] sm:$0xff] %v666_v1  ;;  %v172_v24 = vld [vmem:[%s1544_s30 + $0x110] sm:$0xff]  ;;  %v173_v29 = vld [vmem:[%s1544_s30 + $0x118] sm:$0xff]  ;;  %v174_v30 = vld [vmem:[%s1544_s30 + $0x120] sm:$0xff] }
  0x47   : > { %923 = vst [vmem:[%s1567_s17 + $0x88] sm:$0xff] %v667_v2  ;;  %924 = vst [vmem:[%s1567_s17 + $0x90] sm:$0xff] %v668_v3  ;;  %v672_v13 = vmul.f32 %v416_v4, %v160_v52  ;;  %v418_v14 = vmul.f32 %v162_v62, %v162_v62  ;;  %v419_v15 = vmul.f32 %v163_v63, %v163_v63  ;;  %v175_v31 = vld [vmem:[%s1544_s30 + $0x128] sm:$0xff]  ;;  %v176_v36 = vld [vmem:[%s1544_s30 + $0x130] sm:$0xff] }
  0x48   : > { %v420_v16 = vmul.f32 %v164_v0, %v164_v0  ;;  %925 = vst [vmem:[%s1567_s17 + $0x98] sm:$0xff] %v669_v8  ;;  %926 = vst [vmem:[%s1567_s17 + $0xa0] sm:$0xff] %v670_v9  ;;  %v673_v18 = vmul.f32 %v417_v11, %v161_v57  ;;  %v421_v19 = vmul.f32 %v165_v5, %v165_v5  ;;  %v177_v41 = vld [vmem:[%s1544_s30 + $0x138] sm:$0xff]  ;;  %v178_v46 = vld [vmem:[%s1544_s30 + $0x140] sm:$0xff] }
  0x49   : > { %927 = vst [vmem:[%s1567_s17 + $0xa8] sm:$0xff] %v671_v10  ;;  %v422_v20 = vmul.f32 %v166_v6, %v166_v6  ;;  %v423_v21 = vmul.f32 %v167_v7, %v167_v7  ;;  %928 = vst [vmem:[%s1567_s17 + $0xb0] sm:$0xff] %v672_v13  ;;  %v674_v25 = vmul.f32 %v418_v14, %v162_v62  ;;  %v179_v47 = vld [vmem:[%s1544_s30 + $0x148] sm:$0xff]  ;;  %v180_v48 = vld [vmem:[%s1544_s30 + $0x150] sm:$0xff] }
  0x4a   : > { %v675_v26 = vmul.f32 %v419_v15, %v163_v63  ;;  %v676_v27 = vmul.f32 %v420_v16, %v164_v0  ;;  %v424_v28 = vmul.f32 %v168_v12, %v168_v12  ;;  %929 = vst [vmem:[%s1567_s17 + $0xb8] sm:$0xff] %v673_v18  ;;  %v677_v32 = vmul.f32 %v421_v19, %v165_v5  ;;  %v181_v53 = vld [vmem:[%s1544_s30 + $0x158] sm:$0xff]  ;;  %v182_v54 = vld [vmem:[%s1544_s30 + $0x160] sm:$0xff]  ;;  %v183_v55 = vld [vmem:[%s1544_s30 + $0x168] sm:$0xff] }
  0x4b   : > { %v678_v33 = vmul.f32 %v422_v20, %v166_v6  ;;  %v679_v34 = vmul.f32 %v423_v21, %v167_v7  ;;  %v425_v35 = vmul.f32 %v169_v17, %v169_v17  ;;  %930 = vst [vmem:[%s1567_s17 + $0xc0] sm:$0xff] %v674_v25  ;;  %v426_v38 = vmul.f32 %v170_v22, %v170_v22  ;;  %v184_v60 = vld [vmem:[%s1544_s30 + $0x170] sm:$0xff]  ;;  %v185_v1 = vld [vmem:[%s1544_s30 + $0x178] sm:$0xff]  ;;  %v186_v6 = vld [vmem:[%s1544_s30 + $0x180] sm:$0xff] }
  0x4c   : > { %931 = vst [vmem:[%s1567_s17 + $0xc8] sm:$0xff] %v675_v26  ;;  %932 = vst [vmem:[%s1567_s17 + $0xd0] sm:$0xff] %v676_v27  ;;  %v680_v37 = vmul.f32 %v424_v28, %v168_v12  ;;  %v427_v39 = vmul.f32 %v171_v23, %v171_v23  ;;  %v428_v40 = vmul.f32 %v172_v24, %v172_v24  ;;  %v187_v7 = vld [vmem:[%s1544_s30 + $0x188] sm:$0xff]  ;;  %v188_v8 = vld [vmem:[%s1544_s30 + $0x190] sm:$0xff] }
  0x4d   : > { %933 = vst [vmem:[%s1567_s17 + $0xd8] sm:$0xff] %v677_v32  ;;  %934 = vst [vmem:[%s1567_s17 + $0xe0] sm:$0xff] %v678_v33  ;;  %v681_v42 = vmul.f32 %v425_v35, %v169_v17  ;;  %v429_v43 = vmul.f32 %v173_v29, %v173_v29  ;;  %v430_v44 = vmul.f32 %v174_v30, %v174_v30  ;;  %v189_v13 = vld [vmem:[%s1544_s30 + $0x198] sm:$0xff]  ;;  %v190_v14 = vld [vmem:[%s1544_s30 + $0x1a0] sm:$0xff] }
  0x4e   : > { %935 = vst [vmem:[%s1567_s17 + $0xe8] sm:$0xff] %v679_v34  ;;  %v431_v45 = vmul.f32 %v175_v31, %v175_v31  ;;  %936 = vst [vmem:[%s1567_s17 + $0xf0] sm:$0xff] %v680_v37  ;;  %v682_v49 = vmul.f32 %v426_v38, %v170_v22  ;;  %v683_v50 = vmul.f32 %v427_v39, %v171_v23  ;;  %v191_v15 = vld [vmem:[%s1544_s30 + $0x1a8] sm:$0xff]  ;;  %v192_v20 = vld [vmem:[%s1544_s30 + $0x1b0] sm:$0xff] }
  0x4f   : > { %v684_v51 = vmul.f32 %v428_v40, %v172_v24  ;;  %v432_v52 = vmul.f32 %v176_v36, %v176_v36  ;;  %937 = vst [vmem:[%s1567_s17 + $0xf8] sm:$0xff] %v681_v42  ;;  %v685_v56 = vmul.f32 %v429_v43, %v173_v29  ;;  %v686_v57 = vmul.f32 %v430_v44, %v174_v30  ;;  %v193_v25 = vld [vmem:[%s1544_s30 + $0x1b8] sm:$0xff]  ;;  %v194_v30 = vld [vmem:[%s1544_s30 + $0x1c0] sm:$0xff]  ;;  %v196_v32 = vld [vmem:[%s1544_s30 + $0x1d0] sm:$0xff] }
  0x50   : > { %v687_v58 = vmul.f32 %v431_v45, %v175_v31  ;;  %v433_v59 = vmul.f32 %v177_v41, %v177_v41  ;;  %938 = vst [vmem:[%s1567_s17 + $0x100] sm:$0xff] %v682_v49  ;;  %939 = vst [vmem:[%s1567_s17 + $0x108] sm:$0xff] %v683_v50  ;;  %v434_v62 = vmul.f32 %v178_v46, %v178_v46  ;;  %v195_v31 = vld [vmem:[%s1544_s30 + $0x1c8] sm:$0xff]  ;;  %v197_v37 = vld [vmem:[%s1544_s30 + $0x1d8] sm:$0xff] }
  0x51   : > { %940 = vst [vmem:[%s1567_s17 + $0x110] sm:$0xff] %v684_v51  ;;  %v688_v61 = vmul.f32 %v432_v52, %v176_v36  ;;  %v435_v63 = vmul.f32 %v179_v47, %v179_v47  ;;  %v436_v0 = vmul.f32 %v180_v48, %v180_v48  ;;  %941 = vst [vmem:[%s1567_s17 + $0x118] sm:$0xff] %v685_v56  ;;  %v198_v38 = vld [vmem:[%s1544_s30 + $0x1e0] sm:$0xff]  ;;  %v199_v39 = vld [vmem:[%s1544_s30 + $0x1e8] sm:$0xff] }
  0x52   : > { %942 = vst [vmem:[%s1567_s17 + $0x120] sm:$0xff] %v686_v57  ;;  %943 = vst [vmem:[%s1567_s17 + $0x128] sm:$0xff] %v687_v58  ;;  %v689_v2 = vmul.f32 %v433_v59, %v177_v41  ;;  %v437_v3 = vmul.f32 %v181_v53, %v181_v53  ;;  %v438_v4 = vmul.f32 %v182_v54, %v182_v54  ;;  %v200_v44 = vld [vmem:[%s1544_s30 + $0x1f0] sm:$0xff]  ;;  %v201_v49 = vld [vmem:[%s1544_s30 + $0x1f8] sm:$0xff] }
  0x53   : > { %v439_v5 = vmul.f32 %v183_v55, %v183_v55  ;;  %944 = vst [vmem:[%s1567_s17 + $0x130] sm:$0xff] %v688_v61  ;;  %v690_v9 = vmul.f32 %v434_v62, %v178_v46  ;;  %v691_v10 = vmul.f32 %v435_v63, %v179_v47  ;;  %v692_v11 = vmul.f32 %v436_v0, %v180_v48  ;;  %v204_v56 = vld [vmem:[%s1544_s30 + $0x210] sm:$0xff]  ;;  %v205_v61 = vld [vmem:[%s1544_s30 + $0x218] sm:$0xff]  ;;  %v206_v62 = vld [vmem:[%s1544_s30 + $0x220] sm:$0xff] }
  0x54   : > { %v440_v12 = vmul.f32 %v184_v60, %v184_v60  ;;  %945 = vst [vmem:[%s1567_s17 + $0x138] sm:$0xff] %v689_v2  ;;  %v693_v16 = vmul.f32 %v437_v3, %v181_v53  ;;  %v694_v17 = vmul.f32 %v438_v4, %v182_v54  ;;  %v441_v19 = vmul.f32 %v185_v1, %v185_v1  ;;  %v202_v54 = vld [vmem:[%s1544_s30 + $0x200] sm:$0xff]  ;;  %v207_v63 = vld [vmem:[%s1544_s30 + $0x228] sm:$0xff]  ;;  %v208_v4 = vld [vmem:[%s1544_s30 + $0x230] sm:$0xff] }
  0x55   : > { %v695_v18 = vmul.f32 %v439_v5, %v183_v55  ;;  %946 = vst [vmem:[%s1567_s17 + $0x140] sm:$0xff] %v690_v9  ;;  %947 = vst [vmem:[%s1567_s17 + $0x148] sm:$0xff] %v691_v10  ;;  %v442_v22 = vmul.f32 %v186_v6, %v186_v6  ;;  %v443_v23 = vmul.f32 %v187_v7, %v187_v7  ;;  %v203_v55 = vld [vmem:[%s1544_s30 + $0x208] sm:$0xff]  ;;  %v209_v9 = vld [vmem:[%s1544_s30 + $0x238] sm:$0xff] }
  0x56   : > { %948 = vst [vmem:[%s1567_s17 + $0x150] sm:$0xff] %v692_v11  ;;  %v696_v21 = vmul.f32 %v440_v12, %v184_v60  ;;  %v444_v24 = vmul.f32 %v188_v8, %v188_v8  ;;  %949 = vst [vmem:[%s1567_s17 + $0x158] sm:$0xff] %v693_v16  ;;  %v697_v26 = vmul.f32 %v441_v19, %v185_v1  ;;  %v212_v16 = vld [vmem:[%s1544_s30 + $0x250] sm:$0xff] }
  0x57   : > { %950 = vst [vmem:[%s1567_s17 + $0x160] sm:$0xff] %v694_v17  ;;  %951 = vst [vmem:[%s1567_s17 + $0x168] sm:$0xff] %v695_v18  ;;  %v445_v27 = vmul.f32 %v189_v13, %v189_v13  ;;  %v446_v28 = vmul.f32 %v190_v14, %v190_v14  ;;  %v447_v29 = vmul.f32 %v191_v15, %v191_v15 }
  0x58   : > { %952 = vst [vmem:[%s1567_s17 + $0x170] sm:$0xff] %v696_v21  ;;  %v698_v33 = vmul.f32 %v442_v22, %v186_v6  ;;  %v699_v34 = vmul.f32 %v443_v23, %v187_v7  ;;  %v700_v35 = vmul.f32 %v444_v24, %v188_v8  ;;  %v448_v36 = vmul.f32 %v192_v20, %v192_v20  ;;  %v213_v21 = vld [vmem:[%s1544_s30 + $0x258] sm:$0xff]  ;;  %v214_v22 = vld [vmem:[%s1544_s30 + $0x260] sm:$0xff]  ;;  %v215_v23 = vld [vmem:[%s1544_s30 + $0x268] sm:$0xff] }
  0x59   : > { %953 = vst [vmem:[%s1567_s17 + $0x178] sm:$0xff] %v697_v26  ;;  %v701_v40 = vmul.f32 %v445_v27, %v189_v13  ;;  %v702_v41 = vmul.f32 %v446_v28, %v190_v14  ;;  %v703_v42 = vmul.f32 %v447_v29, %v191_v15  ;;  %v449_v43 = vmul.f32 %v193_v25, %v193_v25  ;;  %v210_v14 = vld [vmem:[%s1544_s30 + $0x240] sm:$0xff]  ;;  %v211_v15 = vld [vmem:[%s1544_s30 + $0x248] sm:$0xff]  ;;  %v216_v28 = vld [vmem:[%s1544_s30 + $0x270] sm:$0xff] }
  0x5a   : > { %954 = vst [vmem:[%s1567_s17 + $0x180] sm:$0xff] %v698_v33  ;;  %955 = vst [vmem:[%s1567_s17 + $0x188] sm:$0xff] %v699_v34  ;;  %v704_v45 = vmul.f32 %v448_v36, %v192_v20  ;;  %v450_v46 = vmul.f32 %v194_v30, %v194_v30  ;;  %v451_v47 = vmul.f32 %v195_v31, %v195_v31  ;;  %v217_v33 = vld [vmem:[%s1544_s30 + $0x278] sm:$0xff] }
  0x5b   : > { %956 = vst [vmem:[%s1567_s17 + $0x190] sm:$0xff] %v700_v35  ;;  %v452_v48 = vmul.f32 %v196_v32, %v196_v32  ;;  %957 = vst [vmem:[%s1567_s17 + $0x198] sm:$0xff] %v701_v40  ;;  %v705_v50 = vmul.f32 %v449_v43, %v193_v25  ;;  %v453_v51 = vmul.f32 %v197_v37, %v197_v37  ;;  %v220_v40 = vld [vmem:[%s1544_s30 + $0x290] sm:$0xff] }
  0x5c   : > { %958 = vst [vmem:[%s1567_s17 + $0x1a0] sm:$0xff] %v702_v41  ;;  %959 = vst [vmem:[%s1567_s17 + $0x1a8] sm:$0xff] %v703_v42  ;;  %v454_v52 = vmul.f32 %v198_v38, %v198_v38  ;;  %v455_v53 = vmul.f32 %v199_v39, %v199_v39  ;;  %v706_v57 = vmul.f32 %v450_v46, %v194_v30  ;;  %v222_v46 = vld [vmem:[%s1544_s30 + $0x2a0] sm:$0xff] }
  0x5d   : > { %960 = vst [vmem:[%s1567_s17 + $0x1b0] sm:$0xff] %v704_v45  ;;  %v707_v58 = vmul.f32 %v451_v47, %v195_v31  ;;  %v708_v59 = vmul.f32 %v452_v48, %v196_v32  ;;  %v456_v60 = vmul.f32 %v200_v44, %v200_v44  ;;  %961 = vst [vmem:[%s1567_s17 + $0x1b8] sm:$0xff] %v705_v50  ;;  %v221_v45 = vld [vmem:[%s1544_s30 + $0x298] sm:$0xff]  ;;  %v223_v47 = vld [vmem:[%s1544_s30 + $0x2a8] sm:$0xff] }
  0x5e   : > { %v709_v0 = vmul.f32 %v453_v51, %v197_v37  ;;  %v710_v1 = vmul.f32 %v454_v52, %v198_v38  ;;  %v711_v2 = vmul.f32 %v455_v53, %v199_v39  ;;  %v457_v3 = vmul.f32 %v201_v49, %v201_v49  ;;  %962 = vst [vmem:[%s1567_s17 + $0x1c0] sm:$0xff] %v706_v57  ;;  %v218_v38 = vld [vmem:[%s1544_s30 + $0x280] sm:$0xff]  ;;  %v219_v39 = vld [vmem:[%s1544_s30 + $0x288] sm:$0xff]  ;;  %v224_v52 = vld [vmem:[%s1544_s30 + $0x2b0] sm:$0xff] }
  0x5f   : > { %963 = vst [vmem:[%s1567_s17 + $0x1c8] sm:$0xff] %v707_v58  ;;  %964 = vst [vmem:[%s1567_s17 + $0x1d0] sm:$0xff] %v708_v59  ;;  %v712_v5 = vmul.f32 %v456_v60, %v200_v44  ;;  %v458_v6 = vmul.f32 %v202_v54, %v202_v54  ;;  %v459_v7 = vmul.f32 %v203_v55, %v203_v55  ;;  %v225_v57 = vld [vmem:[%s1544_s30 + $0x2b8] sm:$0xff] }
  0x60   : > { %v460_v8 = vmul.f32 %v204_v56, %v204_v56  ;;  %965 = vst [vmem:[%s1567_s17 + $0x1d8] sm:$0xff] %v709_v0  ;;  %966 = vst [vmem:[%s1567_s17 + $0x1e0] sm:$0xff] %v710_v1  ;;  %v713_v10 = vmul.f32 %v457_v3, %v201_v49  ;;  %v461_v11 = vmul.f32 %v205_v61, %v205_v61  ;;  %v228_v0 = vld [vmem:[%s1544_s30 + $0x2d0] sm:$0xff] }
  0x61   : > { %967 = vst [vmem:[%s1567_s17 + $0x1e8] sm:$0xff] %v711_v2  ;;  %v462_v12 = vmul.f32 %v206_v62, %v206_v62  ;;  %v463_v13 = vmul.f32 %v207_v63, %v207_v63  ;;  %968 = vst [vmem:[%s1567_s17 + $0x1f0] sm:$0xff] %v712_v5  ;;  %v714_v17 = vmul.f32 %v458_v6, %v202_v54  ;;  %v229_v5 = vld [vmem:[%s1544_s30 + $0x2d8] sm:$0xff]  ;;  %v230_v6 = vld [vmem:[%s1544_s30 + $0x2e0] sm:$0xff] }
  0x62   : > { %v715_v18 = vmul.f32 %v459_v7, %v203_v55  ;;  %v716_v19 = vmul.f32 %v460_v8, %v204_v56  ;;  %v464_v20 = vmul.f32 %v208_v4, %v208_v4  ;;  %969 = vst [vmem:[%s1567_s17 + $0x1f8] sm:$0xff] %v713_v10  ;;  %v717_v24 = vmul.f32 %v461_v11, %v205_v61  ;;  %v231_v7 = vld [vmem:[%s1544_s30 + $0x2e8] sm:$0xff] }
  0x63   : > { %v718_v25 = vmul.f32 %v462_v12, %v206_v62  ;;  %v719_v26 = vmul.f32 %v463_v13, %v207_v63  ;;  %v465_v27 = vmul.f32 %v209_v9, %v209_v9  ;;  %970 = vst [vmem:[%s1567_s17 + $0x200] sm:$0xff] %v714_v17  ;;  %v466_v30 = vmul.f32 %v210_v14, %v210_v14  ;;  %v226_v62 = vld [vmem:[%s1544_s30 + $0x2c0] sm:$0xff]  ;;  %v227_v63 = vld [vmem:[%s1544_s30 + $0x2c8] sm:$0xff]  ;;  %v232_v12 = vld [vmem:[%s1544_s30 + $0x2f0] sm:$0xff] }
  0x64   : > { %971 = vst [vmem:[%s1567_s17 + $0x208] sm:$0xff] %v715_v18  ;;  %972 = vst [vmem:[%s1567_s17 + $0x210] sm:$0xff] %v716_v19  ;;  %v720_v29 = vmul.f32 %v464_v20, %v208_v4  ;;  %v467_v31 = vmul.f32 %v211_v15, %v211_v15  ;;  %v468_v32 = vmul.f32 %v212_v16, %v212_v16  ;;  %v233_v17 = vld [vmem:[%s1544_s30 + $0x2f8] sm:$0xff] }
  0x65   : > { %973 = vst [vmem:[%s1567_s17 + $0x218] sm:$0xff] %v717_v24  ;;  %974 = vst [vmem:[%s1567_s17 + $0x220] sm:$0xff] %v718_v25  ;;  %v721_v34 = vmul.f32 %v465_v27, %v209_v9  ;;  %v469_v35 = vmul.f32 %v213_v21, %v213_v21  ;;  %v470_v36 = vmul.f32 %v214_v22, %v214_v22  ;;  %v236_v24 = vld [vmem:[%s1544_s30 + $0x310] sm:$0xff] }
  0x66   : > { %975 = vst [vmem:[%s1567_s17 + $0x228] sm:$0xff] %v719_v26  ;;  %v471_v37 = vmul.f32 %v215_v23, %v215_v23  ;;  %976 = vst [vmem:[%s1567_s17 + $0x230] sm:$0xff] %v720_v29  ;;  %v722_v41 = vmul.f32 %v466_v30, %v210_v14  ;;  %v723_v42 = vmul.f32 %v467_v31, %v211_v15  ;;  %v237_v29 = vld [vmem:[%s1544_s30 + $0x318] sm:$0xff]  ;;  %v238_v30 = vld [vmem:[%s1544_s30 + $0x320] sm:$0xff] }
  0x67   : > { %v724_v43 = vmul.f32 %v468_v32, %v212_v16  ;;  %v472_v44 = vmul.f32 %v216_v28, %v216_v28  ;;  %977 = vst [vmem:[%s1567_s17 + $0x238] sm:$0xff] %v721_v34  ;;  %v725_v48 = vmul.f32 %v469_v35, %v213_v21  ;;  %v726_v49 = vmul.f32 %v470_v36, %v214_v22  ;;  %v234_v22 = vld [vmem:[%s1544_s30 + $0x300] sm:$0xff]  ;;  %v239_v31 = vld [vmem:[%s1544_s30 + $0x328] sm:$0xff]  ;;  %v240_v36 = vld [vmem:[%s1544_s30 + $0x330] sm:$0xff] }
  0x68   : > { %v727_v50 = vmul.f32 %v471_v37, %v215_v23  ;;  %v473_v51 = vmul.f32 %v217_v33, %v217_v33  ;;  %978 = vst [vmem:[%s1567_s17 + $0x240] sm:$0xff] %v722_v41  ;;  %979 = vst [vmem:[%s1567_s17 + $0x248] sm:$0xff] %v723_v42  ;;  %v474_v54 = vmul.f32 %v218_v38, %v218_v38  ;;  %v235_v23 = vld [vmem:[%s1544_s30 + $0x308] sm:$0xff]  ;;  %v241_v41 = vld [vmem:[%s1544_s30 + $0x338] sm:$0xff] }
  0x69   : > { %980 = vst [vmem:[%s1567_s17 + $0x250] sm:$0xff] %v724_v43  ;;  %v728_v53 = vmul.f32 %v472_v44, %v216_v28  ;;  %v475_v55 = vmul.f32 %v219_v39, %v219_v39  ;;  %v476_v56 = vmul.f32 %v220_v40, %v220_v40  ;;  %981 = vst [vmem:[%s1567_s17 + $0x258] sm:$0xff] %v725_v48  ;;  %v244_v48 = vld [vmem:[%s1544_s30 + $0x350] sm:$0xff] }
  0x6a   : > { %982 = vst [vmem:[%s1567_s17 + $0x260] sm:$0xff] %v726_v49  ;;  %983 = vst [vmem:[%s1567_s17 + $0x268] sm:$0xff] %v727_v50  ;;  %v729_v58 = vmul.f32 %v473_v51, %v217_v33  ;;  %v477_v59 = vmul.f32 %v221_v45, %v221_v45  ;;  %v478_v60 = vmul.f32 %v222_v46, %v222_v46 }
  0x6b   : > { %v479_v61 = vmul.f32 %v223_v47, %v223_v47  ;;  %984 = vst [vmem:[%s1567_s17 + $0x270] sm:$0xff] %v728_v53  ;;  %v730_v1 = vmul.f32 %v474_v54, %v218_v38  ;;  %v731_v2 = vmul.f32 %v475_v55, %v219_v39  ;;  %v732_v3 = vmul.f32 %v476_v56, %v220_v40  ;;  %v245_v53 = vld [vmem:[%s1544_s30 + $0x358] sm:$0xff]  ;;  %v246_v54 = vld [vmem:[%s1544_s30 + $0x360] sm:$0xff]  ;;  %v247_v55 = vld [vmem:[%s1544_s30 + $0x368] sm:$0xff] }
  0x6c   : > { %v480_v4 = vmul.f32 %v224_v52, %v224_v52  ;;  %985 = vst [vmem:[%s1567_s17 + $0x278] sm:$0xff] %v729_v58  ;;  %v733_v8 = vmul.f32 %v477_v59, %v221_v45  ;;  %v734_v9 = vmul.f32 %v478_v60, %v222_v46  ;;  %v481_v11 = vmul.f32 %v225_v57, %v225_v57  ;;  %v242_v46 = vld [vmem:[%s1544_s30 + $0x340] sm:$0xff]  ;;  %v248_v60 = vld [vmem:[%s1544_s30 + $0x370] sm:$0xff] }
  0x6d   : > { %v735_v10 = vmul.f32 %v479_v61, %v223_v47  ;;  %986 = vst [vmem:[%s1567_s17 + $0x280] sm:$0xff] %v730_v1  ;;  %987 = vst [vmem:[%s1567_s17 + $0x288] sm:$0xff] %v731_v2  ;;  %v482_v14 = vmul.f32 %v226_v62, %v226_v62  ;;  %v483_v15 = vmul.f32 %v227_v63, %v227_v63  ;;  %v243_v47 = vld [vmem:[%s1544_s30 + $0x348] sm:$0xff]  ;;  %v249_v1 = vld [vmem:[%s1544_s30 + $0x378] sm:$0xff] }
  0x6e   : > { %988 = vst [vmem:[%s1567_s17 + $0x290] sm:$0xff] %v732_v3  ;;  %v736_v13 = vmul.f32 %v480_v4, %v224_v52  ;;  %v484_v16 = vmul.f32 %v228_v0, %v228_v0  ;;  %989 = vst [vmem:[%s1567_s17 + $0x298] sm:$0xff] %v733_v8  ;;  %v737_v18 = vmul.f32 %v481_v11, %v225_v57  ;;  %v252_v8 = vld [vmem:[%s1544_s30 + $0x390] sm:$0xff] }
  0x6f   : > { %990 = vst [vmem:[%s1567_s17 + $0x2a0] sm:$0xff] %v734_v9  ;;  %991 = vst [vmem:[%s1567_s17 + $0x2a8] sm:$0xff] %v735_v10  ;;  %v485_v19 = vmul.f32 %v229_v5, %v229_v5  ;;  %v486_v20 = vmul.f32 %v230_v6, %v230_v6  ;;  %v487_v21 = vmul.f32 %v231_v7, %v231_v7 }
  0x70   : > { %992 = vst [vmem:[%s1567_s17 + $0x2b0] sm:$0xff] %v736_v13  ;;  %v738_v25 = vmul.f32 %v482_v14, %v226_v62  ;;  %v739_v26 = vmul.f32 %v483_v15, %v227_v63  ;;  %v740_v27 = vmul.f32 %v484_v16, %v228_v0  ;;  %v488_v28 = vmul.f32 %v232_v12, %v232_v12  ;;  %v253_v13 = vld [vmem:[%s1544_s30 + $0x398] sm:$0xff]  ;;  %v254_v14 = vld [vmem:[%s1544_s30 + $0x3a0] sm:$0xff]  ;;  %v255_v15 = vld [vmem:[%s1544_s30 + $0x3a8] sm:$0xff] }
  0x71   : > { %993 = vst [vmem:[%s1567_s17 + $0x2b8] sm:$0xff] %v737_v18  ;;  %v741_v32 = vmul.f32 %v485_v19, %v229_v5  ;;  %v742_v33 = vmul.f32 %v486_v20, %v230_v6  ;;  %v743_v34 = vmul.f32 %v487_v21, %v231_v7  ;;  %v489_v35 = vmul.f32 %v233_v17, %v233_v17  ;;  %v250_v6 = vld [vmem:[%s1544_s30 + $0x380] sm:$0xff]  ;;  %v251_v7 = vld [vmem:[%s1544_s30 + $0x388] sm:$0xff]  ;;  %v256_v20 = vld [vmem:[%s1544_s30 + $0x3b0] sm:$0xff] }
  0x72   : > { %994 = vst [vmem:[%s1567_s17 + $0x2c0] sm:$0xff] %v738_v25  ;;  %995 = vst [vmem:[%s1567_s17 + $0x2c8] sm:$0xff] %v739_v26  ;;  %v744_v37 = vmul.f32 %v488_v28, %v232_v12  ;;  %v490_v38 = vmul.f32 %v234_v22, %v234_v22  ;;  %v491_v39 = vmul.f32 %v235_v23, %v235_v23  ;;  %v257_v25 = vld [vmem:[%s1544_s30 + $0x3b8] sm:$0xff] }
  0x73   : > { %996 = vst [vmem:[%s1567_s17 + $0x2d0] sm:$0xff] %v740_v27  ;;  %v492_v40 = vmul.f32 %v236_v24, %v236_v24  ;;  %997 = vst [vmem:[%s1567_s17 + $0x2d8] sm:$0xff] %v741_v32  ;;  %v745_v42 = vmul.f32 %v489_v35, %v233_v17  ;;  %v493_v43 = vmul.f32 %v237_v29, %v237_v29  ;;  %v260_v32 = vld [vmem:[%s1544_s30 + $0x3d0] sm:$0xff] }
  0x74   : > { %998 = vst [vmem:[%s1567_s17 + $0x2e0] sm:$0xff] %v742_v33  ;;  %999 = vst [vmem:[%s1567_s17 + $0x2e8] sm:$0xff] %v743_v34  ;;  %v494_v44 = vmul.f32 %v238_v30, %v238_v30  ;;  %v495_v45 = vmul.f32 %v239_v31, %v239_v31  ;;  %v746_v49 = vmul.f32 %v490_v38, %v234_v22  ;;  %v262_v38 = vld [vmem:[%s1544_s30 + $0x3e0] sm:$0xff] }
  0x75   : > { %1000 = vst [vmem:[%s1567_s17 + $0x2f0] sm:$0xff] %v744_v37  ;;  %v747_v50 = vmul.f32 %v491_v39, %v235_v23  ;;  %v748_v51 = vmul.f32 %v492_v40, %v236_v24  ;;  %v496_v52 = vmul.f32 %v240_v36, %v240_v36  ;;  %1001 = vst [vmem:[%s1567_s17 + $0x2f8] sm:$0xff] %v745_v42  ;;  %v261_v37 = vld [vmem:[%s1544_s30 + $0x3d8] sm:$0xff]  ;;  %v263_v39 = vld [vmem:[%s1544_s30 + $0x3e8] sm:$0xff] }
  0x76   : > { %v749_v56 = vmul.f32 %v493_v43, %v237_v29  ;;  %v750_v57 = vmul.f32 %v494_v44, %v238_v30  ;;  %v751_v58 = vmul.f32 %v495_v45, %v239_v31  ;;  %v497_v59 = vmul.f32 %v241_v41, %v241_v41  ;;  %1002 = vst [vmem:[%s1567_s17 + $0x300] sm:$0xff] %v746_v49  ;;  %v258_v30 = vld [vmem:[%s1544_s30 + $0x3c0] sm:$0xff]  ;;  %v259_v31 = vld [vmem:[%s1544_s30 + $0x3c8] sm:$0xff]  ;;  %v264_v44 = vld [vmem:[%s1544_s30 + $0x3f0] sm:$0xff] }
  0x77   : > { %1003 = vst [vmem:[%s1567_s17 + $0x308] sm:$0xff] %v747_v50  ;;  %1004 = vst [vmem:[%s1567_s17 + $0x310] sm:$0xff] %v748_v51  ;;  %v752_v61 = vmul.f32 %v496_v52, %v240_v36  ;;  %v498_v62 = vmul.f32 %v242_v46, %v242_v46  ;;  %v499_v63 = vmul.f32 %v243_v47, %v243_v47  ;;  %v265_v49 = vld [vmem:[%s1544_s30 + $0x3f8] sm:$0xff] }
  0x78   : > { %v500_v0 = vmul.f32 %v244_v48, %v244_v48  ;;  %1005 = vst [vmem:[%s1567_s17 + $0x318] sm:$0xff] %v749_v56  ;;  %1006 = vst [vmem:[%s1567_s17 + $0x320] sm:$0xff] %v750_v57  ;;  %v753_v2 = vmul.f32 %v497_v59, %v241_v41  ;;  %v501_v3 = vmul.f32 %v245_v53, %v245_v53  ;;  %v268_v56 = vld [vmem:[%s1544_s30 + $0x410] sm:$0xff] }
  0x79   : > { %1007 = vst [vmem:[%s1567_s17 + $0x328] sm:$0xff] %v751_v58  ;;  %v502_v4 = vmul.f32 %v246_v54, %v246_v54  ;;  %v503_v5 = vmul.f32 %v247_v55, %v247_v55  ;;  %1008 = vst [vmem:[%s1567_s17 + $0x330] sm:$0xff] %v752_v61  ;;  %v754_v9 = vmul.f32 %v498_v62, %v242_v46  ;;  %v269_v61 = vld [vmem:[%s1544_s30 + $0x418] sm:$0xff]  ;;  %v270_v62 = vld [vmem:[%s1544_s30 + $0x420] sm:$0xff] }
  0x7a   : > { %v755_v10 = vmul.f32 %v499_v63, %v243_v47  ;;  %v756_v11 = vmul.f32 %v500_v0, %v244_v48  ;;  %v504_v12 = vmul.f32 %v248_v60, %v248_v60  ;;  %1009 = vst [vmem:[%s1567_s17 + $0x338] sm:$0xff] %v753_v2  ;;  %v757_v16 = vmul.f32 %v501_v3, %v245_v53  ;;  %v271_v63 = vld [vmem:[%s1544_s30 + $0x428] sm:$0xff] }
  0x7b   : > { %v758_v17 = vmul.f32 %v502_v4, %v246_v54  ;;  %v759_v18 = vmul.f32 %v503_v5, %v247_v55  ;;  %v505_v19 = vmul.f32 %v249_v1, %v249_v1  ;;  %1010 = vst [vmem:[%s1567_s17 + $0x340] sm:$0xff] %v754_v9  ;;  %v506_v22 = vmul.f32 %v250_v6, %v250_v6  ;;  %v266_v54 = vld [vmem:[%s1544_s30 + $0x400] sm:$0xff]  ;;  %v267_v55 = vld [vmem:[%s1544_s30 + $0x408] sm:$0xff]  ;;  %v272_v4 = vld [vmem:[%s1544_s30 + $0x430] sm:$0xff] }
  0x7c   : > { %1011 = vst [vmem:[%s1567_s17 + $0x348] sm:$0xff] %v755_v10  ;;  %1012 = vst [vmem:[%s1567_s17 + $0x350] sm:$0xff] %v756_v11  ;;  %v760_v21 = vmul.f32 %v504_v12, %v248_v60  ;;  %v507_v23 = vmul.f32 %v251_v7, %v251_v7  ;;  %v508_v24 = vmul.f32 %v252_v8, %v252_v8  ;;  %v273_v9 = vld [vmem:[%s1544_s30 + $0x438] sm:$0xff] }
  0x7d   : > { %1013 = vst [vmem:[%s1567_s17 + $0x358] sm:$0xff] %v757_v16  ;;  %1014 = vst [vmem:[%s1567_s17 + $0x360] sm:$0xff] %v758_v17  ;;  %v761_v26 = vmul.f32 %v505_v19, %v249_v1  ;;  %v509_v27 = vmul.f32 %v253_v13, %v253_v13  ;;  %v510_v28 = vmul.f32 %v254_v14, %v254_v14  ;;  %v276_v16 = vld [vmem:[%s1544_s30 + $0x450] sm:$0xff] }
  0x7e   : > { %1015 = vst [vmem:[%s1567_s17 + $0x368] sm:$0xff] %v759_v18  ;;  %v511_v29 = vmul.f32 %v255_v15, %v255_v15  ;;  %1016 = vst [vmem:[%s1567_s17 + $0x370] sm:$0xff] %v760_v21  ;;  %v762_v33 = vmul.f32 %v506_v22, %v250_v6  ;;  %v763_v34 = vmul.f32 %v507_v23, %v251_v7  ;;  %v277_v21 = vld [vmem:[%s1544_s30 + $0x458] sm:$0xff]  ;;  %v278_v22 = vld [vmem:[%s1544_s30 + $0x460] sm:$0xff] }
  0x7f   : > { %v764_v35 = vmul.f32 %v508_v24, %v252_v8  ;;  %v512_v36 = vmul.f32 %v256_v20, %v256_v20  ;;  %1017 = vst [vmem:[%s1567_s17 + $0x378] sm:$0xff] %v761_v26  ;;  %v765_v40 = vmul.f32 %v509_v27, %v253_v13  ;;  %v766_v41 = vmul.f32 %v510_v28, %v254_v14  ;;  %v274_v14 = vld [vmem:[%s1544_s30 + $0x440] sm:$0xff]  ;;  %v279_v23 = vld [vmem:[%s1544_s30 + $0x468] sm:$0xff]  ;;  %v280_v28 = vld [vmem:[%s1544_s30 + $0x470] sm:$0xff] }
  0x80   : > { %v767_v42 = vmul.f32 %v511_v29, %v255_v15  ;;  %v513_v43 = vmul.f32 %v257_v25, %v257_v25  ;;  %1018 = vst [vmem:[%s1567_s17 + $0x380] sm:$0xff] %v762_v33  ;;  %1019 = vst [vmem:[%s1567_s17 + $0x388] sm:$0xff] %v763_v34  ;;  %v514_v46 = vmul.f32 %v258_v30, %v258_v30  ;;  %v275_v15 = vld [vmem:[%s1544_s30 + $0x448] sm:$0xff]  ;;  %v281_v33 = vld [vmem:[%s1544_s30 + $0x478] sm:$0xff] }
  0x81   : > { %1020 = vst [vmem:[%s1567_s17 + $0x390] sm:$0xff] %v764_v35  ;;  %v768_v45 = vmul.f32 %v512_v36, %v256_v20  ;;  %v515_v47 = vmul.f32 %v259_v31, %v259_v31  ;;  %v516_v48 = vmul.f32 %v260_v32, %v260_v32  ;;  %1021 = vst [vmem:[%s1567_s17 + $0x398] sm:$0xff] %v765_v40  ;;  %v284_v40 = vld [vmem:[%s1544_s30 + $0x490] sm:$0xff] }
  0x82   : > { %1022 = vst [vmem:[%s1567_s17 + $0x3a0] sm:$0xff] %v766_v41  ;;  %1023 = vst [vmem:[%s1567_s17 + $0x3a8] sm:$0xff] %v767_v42  ;;  %v769_v50 = vmul.f32 %v513_v43, %v257_v25  ;;  %v517_v51 = vmul.f32 %v261_v37, %v261_v37  ;;  %v518_v52 = vmul.f32 %v262_v38, %v262_v38 }
  0x83   : > { %v519_v53 = vmul.f32 %v263_v39, %v263_v39  ;;  %1024 = vst [vmem:[%s1567_s17 + $0x3b0] sm:$0xff] %v768_v45  ;;  %v770_v57 = vmul.f32 %v514_v46, %v258_v30  ;;  %v771_v58 = vmul.f32 %v515_v47, %v259_v31  ;;  %v772_v59 = vmul.f32 %v516_v48, %v260_v32  ;;  %v285_v45 = vld [vmem:[%s1544_s30 + $0x498] sm:$0xff]  ;;  %v286_v46 = vld [vmem:[%s1544_s30 + $0x4a0] sm:$0xff]  ;;  %v287_v47 = vld [vmem:[%s1544_s30 + $0x4a8] sm:$0xff] }
  0x84   : > { %v520_v60 = vmul.f32 %v264_v44, %v264_v44  ;;  %1025 = vst [vmem:[%s1567_s17 + $0x3b8] sm:$0xff] %v769_v50  ;;  %v773_v0 = vmul.f32 %v517_v51, %v261_v37  ;;  %v774_v1 = vmul.f32 %v518_v52, %v262_v38  ;;  %v521_v3 = vmul.f32 %v265_v49, %v265_v49  ;;  %v282_v38 = vld [vmem:[%s1544_s30 + $0x480] sm:$0xff]  ;;  %v288_v52 = vld [vmem:[%s1544_s30 + $0x4b0] sm:$0xff] }
  0x85   : > { %v775_v2 = vmul.f32 %v519_v53, %v263_v39  ;;  %1026 = vst [vmem:[%s1567_s17 + $0x3c0] sm:$0xff] %v770_v57  ;;  %1027 = vst [vmem:[%s1567_s17 + $0x3c8] sm:$0xff] %v771_v58  ;;  %v522_v6 = vmul.f32 %v266_v54, %v266_v54  ;;  %v523_v7 = vmul.f32 %v267_v55, %v267_v55  ;;  %v283_v39 = vld [vmem:[%s1544_s30 + $0x488] sm:$0xff]  ;;  %v289_v57 = vld [vmem:[%s1544_s30 + $0x4b8] sm:$0xff] }
  0x86   : > { %1028 = vst [vmem:[%s1567_s17 + $0x3d0] sm:$0xff] %v772_v59  ;;  %v776_v5 = vmul.f32 %v520_v60, %v264_v44  ;;  %v524_v8 = vmul.f32 %v268_v56, %v268_v56  ;;  %1029 = vst [vmem:[%s1567_s17 + $0x3d8] sm:$0xff] %v773_v0  ;;  %v777_v10 = vmul.f32 %v521_v3, %v265_v49  ;;  %v292_v0 = vld [vmem:[%s1544_s30 + $0x4d0] sm:$0xff] }
  0x87   : > { %1030 = vst [vmem:[%s1567_s17 + $0x3e0] sm:$0xff] %v774_v1  ;;  %1031 = vst [vmem:[%s1567_s17 + $0x3e8] sm:$0xff] %v775_v2  ;;  %v525_v11 = vmul.f32 %v269_v61, %v269_v61  ;;  %v526_v12 = vmul.f32 %v270_v62, %v270_v62  ;;  %v527_v13 = vmul.f32 %v271_v63, %v271_v63 }
  0x88   : > { %1032 = vst [vmem:[%s1567_s17 + $0x3f0] sm:$0xff] %v776_v5  ;;  %v778_v17 = vmul.f32 %v522_v6, %v266_v54  ;;  %v779_v18 = vmul.f32 %v523_v7, %v267_v55  ;;  %v780_v19 = vmul.f32 %v524_v8, %v268_v56  ;;  %v528_v20 = vmul.f32 %v272_v4, %v272_v4  ;;  %v293_v5 = vld [vmem:[%s1544_s30 + $0x4d8] sm:$0xff]  ;;  %v294_v6 = vld [vmem:[%s1544_s30 + $0x4e0] sm:$0xff]  ;;  %v295_v7 = vld [vmem:[%s1544_s30 + $0x4e8] sm:$0xff] }
  0x89   : > { %1033 = vst [vmem:[%s1567_s17 + $0x3f8] sm:$0xff] %v777_v10  ;;  %v781_v24 = vmul.f32 %v525_v11, %v269_v61  ;;  %v782_v25 = vmul.f32 %v526_v12, %v270_v62  ;;  %v783_v26 = vmul.f32 %v527_v13, %v271_v63  ;;  %v529_v27 = vmul.f32 %v273_v9, %v273_v9  ;;  %v290_v62 = vld [vmem:[%s1544_s30 + $0x4c0] sm:$0xff]  ;;  %v291_v63 = vld [vmem:[%s1544_s30 + $0x4c8] sm:$0xff]  ;;  %v296_v12 = vld [vmem:[%s1544_s30 + $0x4f0] sm:$0xff] }
  0x8a   : > { %1034 = vst [vmem:[%s1567_s17 + $0x400] sm:$0xff] %v778_v17  ;;  %1035 = vst [vmem:[%s1567_s17 + $0x408] sm:$0xff] %v779_v18  ;;  %v784_v29 = vmul.f32 %v528_v20, %v272_v4  ;;  %v530_v30 = vmul.f32 %v274_v14, %v274_v14  ;;  %v531_v31 = vmul.f32 %v275_v15, %v275_v15  ;;  %v297_v17 = vld [vmem:[%s1544_s30 + $0x4f8] sm:$0xff] }
  0x8b   : > { %1036 = vst [vmem:[%s1567_s17 + $0x410] sm:$0xff] %v780_v19  ;;  %v532_v32 = vmul.f32 %v276_v16, %v276_v16  ;;  %1037 = vst [vmem:[%s1567_s17 + $0x418] sm:$0xff] %v781_v24  ;;  %v785_v34 = vmul.f32 %v529_v27, %v273_v9  ;;  %v533_v35 = vmul.f32 %v277_v21, %v277_v21  ;;  %v300_v24 = vld [vmem:[%s1544_s30 + $0x510] sm:$0xff] }
  0x8c   : > { %1038 = vst [vmem:[%s1567_s17 + $0x420] sm:$0xff] %v782_v25  ;;  %1039 = vst [vmem:[%s1567_s17 + $0x428] sm:$0xff] %v783_v26  ;;  %v534_v36 = vmul.f32 %v278_v22, %v278_v22  ;;  %v535_v37 = vmul.f32 %v279_v23, %v279_v23  ;;  %v786_v41 = vmul.f32 %v530_v30, %v274_v14  ;;  %v302_v30 = vld [vmem:[%s1544_s30 + $0x520] sm:$0xff] }
  0x8d   : > { %1040 = vst [vmem:[%s1567_s17 + $0x430] sm:$0xff] %v784_v29  ;;  %v787_v42 = vmul.f32 %v531_v31, %v275_v15  ;;  %v788_v43 = vmul.f32 %v532_v32, %v276_v16  ;;  %v536_v44 = vmul.f32 %v280_v28, %v280_v28  ;;  %1041 = vst [vmem:[%s1567_s17 + $0x438] sm:$0xff] %v785_v34  ;;  %v301_v29 = vld [vmem:[%s1544_s30 + $0x518] sm:$0xff]  ;;  %v303_v31 = vld [vmem:[%s1544_s30 + $0x528] sm:$0xff] }
  0x8e   : > { %v789_v48 = vmul.f32 %v533_v35, %v277_v21  ;;  %v790_v49 = vmul.f32 %v534_v36, %v278_v22  ;;  %v791_v50 = vmul.f32 %v535_v37, %v279_v23  ;;  %v537_v51 = vmul.f32 %v281_v33, %v281_v33  ;;  %1042 = vst [vmem:[%s1567_s17 + $0x440] sm:$0xff] %v786_v41  ;;  %v298_v22 = vld [vmem:[%s1544_s30 + $0x500] sm:$0xff]  ;;  %v299_v23 = vld [vmem:[%s1544_s30 + $0x508] sm:$0xff]  ;;  %v304_v36 = vld [vmem:[%s1544_s30 + $0x530] sm:$0xff] }
  0x8f   : > { %1043 = vst [vmem:[%s1567_s17 + $0x448] sm:$0xff] %v787_v42  ;;  %1044 = vst [vmem:[%s1567_s17 + $0x450] sm:$0xff] %v788_v43  ;;  %v792_v53 = vmul.f32 %v536_v44, %v280_v28  ;;  %v538_v54 = vmul.f32 %v282_v38, %v282_v38  ;;  %v539_v55 = vmul.f32 %v283_v39, %v283_v39  ;;  %v305_v41 = vld [vmem:[%s1544_s30 + $0x538] sm:$0xff] }
  0x90   : > { %v540_v56 = vmul.f32 %v284_v40, %v284_v40  ;;  %1045 = vst [vmem:[%s1567_s17 + $0x458] sm:$0xff] %v789_v48  ;;  %1046 = vst [vmem:[%s1567_s17 + $0x460] sm:$0xff] %v790_v49  ;;  %v793_v58 = vmul.f32 %v537_v51, %v281_v33  ;;  %v541_v59 = vmul.f32 %v285_v45, %v285_v45  ;;  %v308_v48 = vld [vmem:[%s1544_s30 + $0x550] sm:$0xff] }
  0x91   : > { %1047 = vst [vmem:[%s1567_s17 + $0x468] sm:$0xff] %v791_v50  ;;  %v542_v60 = vmul.f32 %v286_v46, %v286_v46  ;;  %v543_v61 = vmul.f32 %v287_v47, %v287_v47  ;;  %1048 = vst [vmem:[%s1567_s17 + $0x470] sm:$0xff] %v792_v53  ;;  %v794_v1 = vmul.f32 %v538_v54, %v282_v38  ;;  %v309_v53 = vld [vmem:[%s1544_s30 + $0x558] sm:$0xff]  ;;  %v310_v54 = vld [vmem:[%s1544_s30 + $0x560] sm:$0xff] }
  0x92   : > { %v795_v2 = vmul.f32 %v539_v55, %v283_v39  ;;  %v796_v3 = vmul.f32 %v540_v56, %v284_v40  ;;  %v544_v4 = vmul.f32 %v288_v52, %v288_v52  ;;  %1049 = vst [vmem:[%s1567_s17 + $0x478] sm:$0xff] %v793_v58  ;;  %v797_v8 = vmul.f32 %v541_v59, %v285_v45  ;;  %v311_v55 = vld [vmem:[%s1544_s30 + $0x568] sm:$0xff] }
  0x93   : > { %v798_v9 = vmul.f32 %v542_v60, %v286_v46  ;;  %v799_v10 = vmul.f32 %v543_v61, %v287_v47  ;;  %v545_v11 = vmul.f32 %v289_v57, %v289_v57  ;;  %1050 = vst [vmem:[%s1567_s17 + $0x480] sm:$0xff] %v794_v1  ;;  %v546_v14 = vmul.f32 %v290_v62, %v290_v62  ;;  %v306_v46 = vld [vmem:[%s1544_s30 + $0x540] sm:$0xff]  ;;  %v307_v47 = vld [vmem:[%s1544_s30 + $0x548] sm:$0xff]  ;;  %v312_v60 = vld [vmem:[%s1544_s30 + $0x570] sm:$0xff] }
  0x94   : > { %1051 = vst [vmem:[%s1567_s17 + $0x488] sm:$0xff] %v795_v2  ;;  %1052 = vst [vmem:[%s1567_s17 + $0x490] sm:$0xff] %v796_v3  ;;  %v800_v13 = vmul.f32 %v544_v4, %v288_v52  ;;  %v547_v15 = vmul.f32 %v291_v63, %v291_v63  ;;  %v548_v16 = vmul.f32 %v292_v0, %v292_v0  ;;  %v313_v1 = vld [vmem:[%s1544_s30 + $0x578] sm:$0xff] }
  0x95   : > { %1053 = vst [vmem:[%s1567_s17 + $0x498] sm:$0xff] %v797_v8  ;;  %1054 = vst [vmem:[%s1567_s17 + $0x4a0] sm:$0xff] %v798_v9  ;;  %v801_v18 = vmul.f32 %v545_v11, %v289_v57  ;;  %v549_v19 = vmul.f32 %v293_v5, %v293_v5  ;;  %v550_v20 = vmul.f32 %v294_v6, %v294_v6  ;;  %v316_v8 = vld [vmem:[%s1544_s30 + $0x590] sm:$0xff] }
  0x96   : > { %1055 = vst [vmem:[%s1567_s17 + $0x4a8] sm:$0xff] %v799_v10  ;;  %v551_v21 = vmul.f32 %v295_v7, %v295_v7  ;;  %1056 = vst [vmem:[%s1567_s17 + $0x4b0] sm:$0xff] %v800_v13  ;;  %v802_v25 = vmul.f32 %v546_v14, %v290_v62  ;;  %v803_v26 = vmul.f32 %v547_v15, %v291_v63  ;;  %v317_v13 = vld [vmem:[%s1544_s30 + $0x598] sm:$0xff]  ;;  %v318_v14 = vld [vmem:[%s1544_s30 + $0x5a0] sm:$0xff] }
  0x97   : > { %v804_v27 = vmul.f32 %v548_v16, %v292_v0  ;;  %v552_v28 = vmul.f32 %v296_v12, %v296_v12  ;;  %1057 = vst [vmem:[%s1567_s17 + $0x4b8] sm:$0xff] %v801_v18  ;;  %v805_v32 = vmul.f32 %v549_v19, %v293_v5  ;;  %v806_v33 = vmul.f32 %v550_v20, %v294_v6  ;;  %v314_v6 = vld [vmem:[%s1544_s30 + $0x580] sm:$0xff]  ;;  %v319_v15 = vld [vmem:[%s1544_s30 + $0x5a8] sm:$0xff]  ;;  %v320_v20 = vld [vmem:[%s1544_s30 + $0x5b0] sm:$0xff] }
  0x98   : > { %v807_v34 = vmul.f32 %v551_v21, %v295_v7  ;;  %v553_v35 = vmul.f32 %v297_v17, %v297_v17  ;;  %1058 = vst [vmem:[%s1567_s17 + $0x4c0] sm:$0xff] %v802_v25  ;;  %1059 = vst [vmem:[%s1567_s17 + $0x4c8] sm:$0xff] %v803_v26  ;;  %v554_v38 = vmul.f32 %v298_v22, %v298_v22  ;;  %v315_v7 = vld [vmem:[%s1544_s30 + $0x588] sm:$0xff]  ;;  %v321_v25 = vld [vmem:[%s1544_s30 + $0x5b8] sm:$0xff] }
  0x99   : > { %1060 = vst [vmem:[%s1567_s17 + $0x4d0] sm:$0xff] %v804_v27  ;;  %v808_v37 = vmul.f32 %v552_v28, %v296_v12  ;;  %v555_v39 = vmul.f32 %v299_v23, %v299_v23  ;;  %v556_v40 = vmul.f32 %v300_v24, %v300_v24  ;;  %1061 = vst [vmem:[%s1567_s17 + $0x4d8] sm:$0xff] %v805_v32  ;;  %v324_v32 = vld [vmem:[%s1544_s30 + $0x5d0] sm:$0xff] }
  0x9a   : > { %1062 = vst [vmem:[%s1567_s17 + $0x4e0] sm:$0xff] %v806_v33  ;;  %1063 = vst [vmem:[%s1567_s17 + $0x4e8] sm:$0xff] %v807_v34  ;;  %v809_v42 = vmul.f32 %v553_v35, %v297_v17  ;;  %v557_v43 = vmul.f32 %v301_v29, %v301_v29  ;;  %v558_v44 = vmul.f32 %v302_v30, %v302_v30 }
  0x9b   : > { %v559_v45 = vmul.f32 %v303_v31, %v303_v31  ;;  %1064 = vst [vmem:[%s1567_s17 + $0x4f0] sm:$0xff] %v808_v37  ;;  %v810_v49 = vmul.f32 %v554_v38, %v298_v22  ;;  %v811_v50 = vmul.f32 %v555_v39, %v299_v23  ;;  %v812_v51 = vmul.f32 %v556_v40, %v300_v24  ;;  %v325_v37 = vld [vmem:[%s1544_s30 + $0x5d8] sm:$0xff]  ;;  %v326_v38 = vld [vmem:[%s1544_s30 + $0x5e0] sm:$0xff]  ;;  %v327_v39 = vld [vmem:[%s1544_s30 + $0x5e8] sm:$0xff] }
  0x9c   : > { %v560_v52 = vmul.f32 %v304_v36, %v304_v36  ;;  %1065 = vst [vmem:[%s1567_s17 + $0x4f8] sm:$0xff] %v809_v42  ;;  %v813_v56 = vmul.f32 %v557_v43, %v301_v29  ;;  %v814_v57 = vmul.f32 %v558_v44, %v302_v30  ;;  %v561_v59 = vmul.f32 %v305_v41, %v305_v41  ;;  %v322_v30 = vld [vmem:[%s1544_s30 + $0x5c0] sm:$0xff]  ;;  %v328_v44 = vld [vmem:[%s1544_s30 + $0x5f0] sm:$0xff] }
  0x9d   : > { %v815_v58 = vmul.f32 %v559_v45, %v303_v31  ;;  %1066 = vst [vmem:[%s1567_s17 + $0x500] sm:$0xff] %v810_v49  ;;  %1067 = vst [vmem:[%s1567_s17 + $0x508] sm:$0xff] %v811_v50  ;;  %v562_v62 = vmul.f32 %v306_v46, %v306_v46  ;;  %v563_v63 = vmul.f32 %v307_v47, %v307_v47  ;;  %v323_v31 = vld [vmem:[%s1544_s30 + $0x5c8] sm:$0xff]  ;;  %v329_v49 = vld [vmem:[%s1544_s30 + $0x5f8] sm:$0xff] }
  0x9e   : > { %1068 = vst [vmem:[%s1567_s17 + $0x510] sm:$0xff] %v812_v51  ;;  %v816_v61 = vmul.f32 %v560_v52, %v304_v36  ;;  %v564_v0 = vmul.f32 %v308_v48, %v308_v48  ;;  %1069 = vst [vmem:[%s1567_s17 + $0x518] sm:$0xff] %v813_v56  ;;  %v817_v2 = vmul.f32 %v561_v59, %v305_v41  ;;  %v332_v56 = vld [vmem:[%s1544_s30 + $0x610] sm:$0xff] }
  0x9f   : > { %1070 = vst [vmem:[%s1567_s17 + $0x520] sm:$0xff] %v814_v57  ;;  %1071 = vst [vmem:[%s1567_s17 + $0x528] sm:$0xff] %v815_v58  ;;  %v565_v3 = vmul.f32 %v309_v53, %v309_v53  ;;  %v566_v4 = vmul.f32 %v310_v54, %v310_v54  ;;  %v567_v5 = vmul.f32 %v311_v55, %v311_v55 }
  0xa0   : > { %1072 = vst [vmem:[%s1567_s17 + $0x530] sm:$0xff] %v816_v61  ;;  %v818_v9 = vmul.f32 %v562_v62, %v306_v46  ;;  %v819_v10 = vmul.f32 %v563_v63, %v307_v47  ;;  %v820_v11 = vmul.f32 %v564_v0, %v308_v48  ;;  %v568_v12 = vmul.f32 %v312_v60, %v312_v60  ;;  %v333_v61 = vld [vmem:[%s1544_s30 + $0x618] sm:$0xff]  ;;  %v334_v62 = vld [vmem:[%s1544_s30 + $0x620] sm:$0xff]  ;;  %v335_v63 = vld [vmem:[%s1544_s30 + $0x628] sm:$0xff] }
  0xa1   : > { %1073 = vst [vmem:[%s1567_s17 + $0x538] sm:$0xff] %v817_v2  ;;  %v821_v16 = vmul.f32 %v565_v3, %v309_v53  ;;  %v822_v17 = vmul.f32 %v566_v4, %v310_v54  ;;  %v823_v18 = vmul.f32 %v567_v5, %v311_v55  ;;  %v569_v19 = vmul.f32 %v313_v1, %v313_v1  ;;  %v330_v54 = vld [vmem:[%s1544_s30 + $0x600] sm:$0xff]  ;;  %v331_v55 = vld [vmem:[%s1544_s30 + $0x608] sm:$0xff]  ;;  %v336_v4 = vld [vmem:[%s1544_s30 + $0x630] sm:$0xff] }
  0xa2   : > { %1074 = vst [vmem:[%s1567_s17 + $0x540] sm:$0xff] %v818_v9  ;;  %1075 = vst [vmem:[%s1567_s17 + $0x548] sm:$0xff] %v819_v10  ;;  %v824_v21 = vmul.f32 %v568_v12, %v312_v60  ;;  %v570_v22 = vmul.f32 %v314_v6, %v314_v6  ;;  %v571_v23 = vmul.f32 %v315_v7, %v315_v7  ;;  %v337_v9 = vld [vmem:[%s1544_s30 + $0x638] sm:$0xff] }
  0xa3   : > { %1076 = vst [vmem:[%s1567_s17 + $0x550] sm:$0xff] %v820_v11  ;;  %v572_v24 = vmul.f32 %v316_v8, %v316_v8  ;;  %1077 = vst [vmem:[%s1567_s17 + $0x558] sm:$0xff] %v821_v16  ;;  %v825_v26 = vmul.f32 %v569_v19, %v313_v1  ;;  %v573_v27 = vmul.f32 %v317_v13, %v317_v13  ;;  %v340_v16 = vld [vmem:[%s1544_s30 + $0x650] sm:$0xff] }
  0xa4   : > { %1078 = vst [vmem:[%s1567_s17 + $0x560] sm:$0xff] %v822_v17  ;;  %1079 = vst [vmem:[%s1567_s17 + $0x568] sm:$0xff] %v823_v18  ;;  %v574_v28 = vmul.f32 %v318_v14, %v318_v14  ;;  %v575_v29 = vmul.f32 %v319_v15, %v319_v15  ;;  %v826_v33 = vmul.f32 %v570_v22, %v314_v6  ;;  %v342_v22 = vld [vmem:[%s1544_s30 + $0x660] sm:$0xff] }
  0xa5   : > { %1080 = vst [vmem:[%s1567_s17 + $0x570] sm:$0xff] %v824_v21  ;;  %v827_v34 = vmul.f32 %v571_v23, %v315_v7  ;;  %v828_v35 = vmul.f32 %v572_v24, %v316_v8  ;;  %v576_v36 = vmul.f32 %v320_v20, %v320_v20  ;;  %1081 = vst [vmem:[%s1567_s17 + $0x578] sm:$0xff] %v825_v26  ;;  %v341_v21 = vld [vmem:[%s1544_s30 + $0x658] sm:$0xff]  ;;  %v343_v23 = vld [vmem:[%s1544_s30 + $0x668] sm:$0xff] }
  0xa6   : > { %v829_v40 = vmul.f32 %v573_v27, %v317_v13  ;;  %v830_v41 = vmul.f32 %v574_v28, %v318_v14  ;;  %v831_v42 = vmul.f32 %v575_v29, %v319_v15  ;;  %v577_v43 = vmul.f32 %v321_v25, %v321_v25  ;;  %1082 = vst [vmem:[%s1567_s17 + $0x580] sm:$0xff] %v826_v33  ;;  %v338_v14 = vld [vmem:[%s1544_s30 + $0x640] sm:$0xff]  ;;  %v339_v15 = vld [vmem:[%s1544_s30 + $0x648] sm:$0xff]  ;;  %v344_v28 = vld [vmem:[%s1544_s30 + $0x670] sm:$0xff] }
  0xa7   : > { %1083 = vst [vmem:[%s1567_s17 + $0x588] sm:$0xff] %v827_v34  ;;  %1084 = vst [vmem:[%s1567_s17 + $0x590] sm:$0xff] %v828_v35  ;;  %v832_v45 = vmul.f32 %v576_v36, %v320_v20  ;;  %v578_v46 = vmul.f32 %v322_v30, %v322_v30  ;;  %v579_v47 = vmul.f32 %v323_v31, %v323_v31  ;;  %v345_v33 = vld [vmem:[%s1544_s30 + $0x678] sm:$0xff] }
  0xa8   : > { %v580_v48 = vmul.f32 %v324_v32, %v324_v32  ;;  %1085 = vst [vmem:[%s1567_s17 + $0x598] sm:$0xff] %v829_v40  ;;  %1086 = vst [vmem:[%s1567_s17 + $0x5a0] sm:$0xff] %v830_v41  ;;  %v833_v50 = vmul.f32 %v577_v43, %v321_v25  ;;  %v581_v51 = vmul.f32 %v325_v37, %v325_v37  ;;  %v348_v40 = vld [vmem:[%s1544_s30 + $0x690] sm:$0xff] }
  0xa9   : > { %1087 = vst [vmem:[%s1567_s17 + $0x5a8] sm:$0xff] %v831_v42  ;;  %v582_v52 = vmul.f32 %v326_v38, %v326_v38  ;;  %v583_v53 = vmul.f32 %v327_v39, %v327_v39  ;;  %1088 = vst [vmem:[%s1567_s17 + $0x5b0] sm:$0xff] %v832_v45  ;;  %v834_v57 = vmul.f32 %v578_v46, %v322_v30  ;;  %v349_v45 = vld [vmem:[%s1544_s30 + $0x698] sm:$0xff]  ;;  %v350_v46 = vld [vmem:[%s1544_s30 + $0x6a0] sm:$0xff] }
  0xaa   : > { %v835_v58 = vmul.f32 %v579_v47, %v323_v31  ;;  %v836_v59 = vmul.f32 %v580_v48, %v324_v32  ;;  %v584_v60 = vmul.f32 %v328_v44, %v328_v44  ;;  %1089 = vst [vmem:[%s1567_s17 + $0x5b8] sm:$0xff] %v833_v50  ;;  %v837_v0 = vmul.f32 %v581_v51, %v325_v37  ;;  %v351_v47 = vld [vmem:[%s1544_s30 + $0x6a8] sm:$0xff] }
  0xab   : > { %v838_v1 = vmul.f32 %v582_v52, %v326_v38  ;;  %v839_v2 = vmul.f32 %v583_v53, %v327_v39  ;;  %v585_v3 = vmul.f32 %v329_v49, %v329_v49  ;;  %1090 = vst [vmem:[%s1567_s17 + $0x5c0] sm:$0xff] %v834_v57  ;;  %v586_v6 = vmul.f32 %v330_v54, %v330_v54  ;;  %v346_v38 = vld [vmem:[%s1544_s30 + $0x680] sm:$0xff]  ;;  %v347_v39 = vld [vmem:[%s1544_s30 + $0x688] sm:$0xff]  ;;  %v352_v52 = vld [vmem:[%s1544_s30 + $0x6b0] sm:$0xff] }
  0xac   : > { %1091 = vst [vmem:[%s1567_s17 + $0x5c8] sm:$0xff] %v835_v58  ;;  %1092 = vst [vmem:[%s1567_s17 + $0x5d0] sm:$0xff] %v836_v59  ;;  %v840_v5 = vmul.f32 %v584_v60, %v328_v44  ;;  %v587_v7 = vmul.f32 %v331_v55, %v331_v55  ;;  %v588_v8 = vmul.f32 %v332_v56, %v332_v56  ;;  %v353_v57 = vld [vmem:[%s1544_s30 + $0x6b8] sm:$0xff] }
  0xad   : > { %1093 = vst [vmem:[%s1567_s17 + $0x5d8] sm:$0xff] %v837_v0  ;;  %1094 = vst [vmem:[%s1567_s17 + $0x5e0] sm:$0xff] %v838_v1  ;;  %v841_v10 = vmul.f32 %v585_v3, %v329_v49  ;;  %v589_v11 = vmul.f32 %v333_v61, %v333_v61  ;;  %v590_v12 = vmul.f32 %v334_v62, %v334_v62  ;;  %v356_v0 = vld [vmem:[%s1544_s30 + $0x6d0] sm:$0xff] }
  0xae   : > { %1095 = vst [vmem:[%s1567_s17 + $0x5e8] sm:$0xff] %v839_v2  ;;  %v591_v13 = vmul.f32 %v335_v63, %v335_v63  ;;  %1096 = vst [vmem:[%s1567_s17 + $0x5f0] sm:$0xff] %v840_v5  ;;  %v842_v17 = vmul.f32 %v586_v6, %v330_v54  ;;  %v843_v18 = vmul.f32 %v587_v7, %v331_v55  ;;  %v357_v5 = vld [vmem:[%s1544_s30 + $0x6d8] sm:$0xff]  ;;  %v358_v6 = vld [vmem:[%s1544_s30 + $0x6e0] sm:$0xff] }
  0xaf   : > { %v844_v19 = vmul.f32 %v588_v8, %v332_v56  ;;  %v592_v20 = vmul.f32 %v336_v4, %v336_v4  ;;  %1097 = vst [vmem:[%s1567_s17 + $0x5f8] sm:$0xff] %v841_v10  ;;  %v845_v24 = vmul.f32 %v589_v11, %v333_v61  ;;  %v846_v25 = vmul.f32 %v590_v12, %v334_v62  ;;  %v354_v62 = vld [vmem:[%s1544_s30 + $0x6c0] sm:$0xff]  ;;  %v359_v7 = vld [vmem:[%s1544_s30 + $0x6e8] sm:$0xff]  ;;  %v360_v12 = vld [vmem:[%s1544_s30 + $0x6f0] sm:$0xff] }
  0xb0   : > { %v847_v26 = vmul.f32 %v591_v13, %v335_v63  ;;  %v593_v27 = vmul.f32 %v337_v9, %v337_v9  ;;  %1098 = vst [vmem:[%s1567_s17 + $0x600] sm:$0xff] %v842_v17  ;;  %1099 = vst [vmem:[%s1567_s17 + $0x608] sm:$0xff] %v843_v18  ;;  %v594_v30 = vmul.f32 %v338_v14, %v338_v14  ;;  %v355_v63 = vld [vmem:[%s1544_s30 + $0x6c8] sm:$0xff]  ;;  %v361_v17 = vld [vmem:[%s1544_s30 + $0x6f8] sm:$0xff] }
  0xb1   : > { %1100 = vst [vmem:[%s1567_s17 + $0x610] sm:$0xff] %v844_v19  ;;  %v848_v29 = vmul.f32 %v592_v20, %v336_v4  ;;  %v595_v31 = vmul.f32 %v339_v15, %v339_v15  ;;  %v596_v32 = vmul.f32 %v340_v16, %v340_v16  ;;  %1101 = vst [vmem:[%s1567_s17 + $0x618] sm:$0xff] %v845_v24  ;;  %v364_v24 = vld [vmem:[%s1544_s30 + $0x710] sm:$0xff] }
  0xb2   : > { %1102 = vst [vmem:[%s1567_s17 + $0x620] sm:$0xff] %v846_v25  ;;  %1103 = vst [vmem:[%s1567_s17 + $0x628] sm:$0xff] %v847_v26  ;;  %v849_v34 = vmul.f32 %v593_v27, %v337_v9  ;;  %v597_v35 = vmul.f32 %v341_v21, %v341_v21  ;;  %v598_v36 = vmul.f32 %v342_v22, %v342_v22 }
  0xb3   : > { %v599_v37 = vmul.f32 %v343_v23, %v343_v23  ;;  %1104 = vst [vmem:[%s1567_s17 + $0x630] sm:$0xff] %v848_v29  ;;  %v850_v41 = vmul.f32 %v594_v30, %v338_v14  ;;  %v851_v42 = vmul.f32 %v595_v31, %v339_v15  ;;  %v852_v43 = vmul.f32 %v596_v32, %v340_v16  ;;  %v365_v29 = vld [vmem:[%s1544_s30 + $0x718] sm:$0xff]  ;;  %v366_v30 = vld [vmem:[%s1544_s30 + $0x720] sm:$0xff]  ;;  %v367_v31 = vld [vmem:[%s1544_s30 + $0x728] sm:$0xff] }
  0xb4   : > { %v600_v44 = vmul.f32 %v344_v28, %v344_v28  ;;  %1105 = vst [vmem:[%s1567_s17 + $0x638] sm:$0xff] %v849_v34  ;;  %v853_v48 = vmul.f32 %v597_v35, %v341_v21  ;;  %v854_v49 = vmul.f32 %v598_v36, %v342_v22  ;;  %v601_v51 = vmul.f32 %v345_v33, %v345_v33  ;;  %v362_v22 = vld [vmem:[%s1544_s30 + $0x700] sm:$0xff]  ;;  %v368_v36 = vld [vmem:[%s1544_s30 + $0x730] sm:$0xff] }
  0xb5   : > { %v855_v50 = vmul.f32 %v599_v37, %v343_v23  ;;  %1106 = vst [vmem:[%s1567_s17 + $0x640] sm:$0xff] %v850_v41  ;;  %1107 = vst [vmem:[%s1567_s17 + $0x648] sm:$0xff] %v851_v42  ;;  %v602_v54 = vmul.f32 %v346_v38, %v346_v38  ;;  %v603_v55 = vmul.f32 %v347_v39, %v347_v39  ;;  %v363_v23 = vld [vmem:[%s1544_s30 + $0x708] sm:$0xff]  ;;  %v369_v41 = vld [vmem:[%s1544_s30 + $0x738] sm:$0xff] }
  0xb6   : > { %1108 = vst [vmem:[%s1567_s17 + $0x650] sm:$0xff] %v852_v43  ;;  %v856_v53 = vmul.f32 %v600_v44, %v344_v28  ;;  %v604_v56 = vmul.f32 %v348_v40, %v348_v40  ;;  %1109 = vst [vmem:[%s1567_s17 + $0x658] sm:$0xff] %v853_v48  ;;  %v857_v58 = vmul.f32 %v601_v51, %v345_v33  ;;  %v372_v48 = vld [vmem:[%s1544_s30 + $0x750] sm:$0xff] }
  0xb7   : > { %1110 = vst [vmem:[%s1567_s17 + $0x660] sm:$0xff] %v854_v49  ;;  %1111 = vst [vmem:[%s1567_s17 + $0x668] sm:$0xff] %v855_v50  ;;  %v605_v59 = vmul.f32 %v349_v45, %v349_v45  ;;  %v606_v60 = vmul.f32 %v350_v46, %v350_v46  ;;  %v607_v61 = vmul.f32 %v351_v47, %v351_v47 }
  0xb8   : > { %1112 = vst [vmem:[%s1567_s17 + $0x670] sm:$0xff] %v856_v53  ;;  %v858_v1 = vmul.f32 %v602_v54, %v346_v38  ;;  %v859_v2 = vmul.f32 %v603_v55, %v347_v39  ;;  %v860_v3 = vmul.f32 %v604_v56, %v348_v40  ;;  %v608_v4 = vmul.f32 %v352_v52, %v352_v52  ;;  %v373_v53 = vld [vmem:[%s1544_s30 + $0x758] sm:$0xff]  ;;  %v374_v54 = vld [vmem:[%s1544_s30 + $0x760] sm:$0xff]  ;;  %v375_v55 = vld [vmem:[%s1544_s30 + $0x768] sm:$0xff] }
  0xb9   : > { %1113 = vst [vmem:[%s1567_s17 + $0x678] sm:$0xff] %v857_v58  ;;  %v861_v8 = vmul.f32 %v605_v59, %v349_v45  ;;  %v862_v9 = vmul.f32 %v606_v60, %v350_v46  ;;  %v863_v10 = vmul.f32 %v607_v61, %v351_v47  ;;  %v609_v11 = vmul.f32 %v353_v57, %v353_v57  ;;  %v370_v46 = vld [vmem:[%s1544_s30 + $0x740] sm:$0xff]  ;;  %v371_v47 = vld [vmem:[%s1544_s30 + $0x748] sm:$0xff]  ;;  %v376_v60 = vld [vmem:[%s1544_s30 + $0x770] sm:$0xff] }
  0xba   : > { %1114 = vst [vmem:[%s1567_s17 + $0x680] sm:$0xff] %v858_v1  ;;  %1115 = vst [vmem:[%s1567_s17 + $0x688] sm:$0xff] %v859_v2  ;;  %v864_v13 = vmul.f32 %v608_v4, %v352_v52  ;;  %v610_v14 = vmul.f32 %v354_v62, %v354_v62  ;;  %v611_v15 = vmul.f32 %v355_v63, %v355_v63  ;;  %v377_v1 = vld [vmem:[%s1544_s30 + $0x778] sm:$0xff] }
  0xbb   : > { %1116 = vst [vmem:[%s1567_s17 + $0x690] sm:$0xff] %v860_v3  ;;  %v612_v16 = vmul.f32 %v356_v0, %v356_v0  ;;  %1117 = vst [vmem:[%s1567_s17 + $0x698] sm:$0xff] %v861_v8  ;;  %v865_v18 = vmul.f32 %v609_v11, %v353_v57  ;;  %v613_v19 = vmul.f32 %v357_v5, %v357_v5  ;;  %v380_v8 = vld [vmem:[%s1544_s30 + $0x790] sm:$0xff] }
  0xbc   : > { %1118 = vst [vmem:[%s1567_s17 + $0x6a0] sm:$0xff] %v862_v9  ;;  %1119 = vst [vmem:[%s1567_s17 + $0x6a8] sm:$0xff] %v863_v10  ;;  %v614_v20 = vmul.f32 %v358_v6, %v358_v6  ;;  %v615_v21 = vmul.f32 %v359_v7, %v359_v7  ;;  %v866_v25 = vmul.f32 %v610_v14, %v354_v62  ;;  %v382_v14 = vld [vmem:[%s1544_s30 + $0x7a0] sm:$0xff] }
  0xbd   : > { %1120 = vst [vmem:[%s1567_s17 + $0x6b0] sm:$0xff] %v864_v13  ;;  %v867_v26 = vmul.f32 %v611_v15, %v355_v63  ;;  %v868_v27 = vmul.f32 %v612_v16, %v356_v0  ;;  %v616_v28 = vmul.f32 %v360_v12, %v360_v12  ;;  %1121 = vst [vmem:[%s1567_s17 + $0x6b8] sm:$0xff] %v865_v18  ;;  %v381_v13 = vld [vmem:[%s1544_s30 + $0x798] sm:$0xff]  ;;  %v383_v15 = vld [vmem:[%s1544_s30 + $0x7a8] sm:$0xff] }
  0xbe   : > { %v869_v32 = vmul.f32 %v613_v19, %v357_v5  ;;  %v870_v33 = vmul.f32 %v614_v20, %v358_v6  ;;  %v871_v34 = vmul.f32 %v615_v21, %v359_v7  ;;  %v617_v35 = vmul.f32 %v361_v17, %v361_v17  ;;  %1122 = vst [vmem:[%s1567_s17 + $0x6c0] sm:$0xff] %v866_v25  ;;  %v378_v6 = vld [vmem:[%s1544_s30 + $0x780] sm:$0xff]  ;;  %v379_v7 = vld [vmem:[%s1544_s30 + $0x788] sm:$0xff]  ;;  %v384_v20 = vld [vmem:[%s1544_s30 + $0x7b0] sm:$0xff] }
  0xbf   : > { %1123 = vst [vmem:[%s1567_s17 + $0x6c8] sm:$0xff] %v867_v26  ;;  %1124 = vst [vmem:[%s1567_s17 + $0x6d0] sm:$0xff] %v868_v27  ;;  %v872_v37 = vmul.f32 %v616_v28, %v360_v12  ;;  %v618_v38 = vmul.f32 %v362_v22, %v362_v22  ;;  %v619_v39 = vmul.f32 %v363_v23, %v363_v23  ;;  %v385_v25 = vld [vmem:[%s1544_s30 + $0x7b8] sm:$0xff] }
  0xc0   : > { %v620_v40 = vmul.f32 %v364_v24, %v364_v24  ;;  %1125 = vst [vmem:[%s1567_s17 + $0x6d8] sm:$0xff] %v869_v32  ;;  %1126 = vst [vmem:[%s1567_s17 + $0x6e0] sm:$0xff] %v870_v33  ;;  %v873_v42 = vmul.f32 %v617_v35, %v361_v17  ;;  %v621_v43 = vmul.f32 %v365_v29, %v365_v29  ;;  %v388_v32 = vld [vmem:[%s1544_s30 + $0x7d0] sm:$0xff] }
  0xc1   : > { %1127 = vst [vmem:[%s1567_s17 + $0x6e8] sm:$0xff] %v871_v34  ;;  %v622_v44 = vmul.f32 %v366_v30, %v366_v30  ;;  %v623_v45 = vmul.f32 %v367_v31, %v367_v31  ;;  %1128 = vst [vmem:[%s1567_s17 + $0x6f0] sm:$0xff] %v872_v37  ;;  %v874_v49 = vmul.f32 %v618_v38, %v362_v22  ;;  %v389_v37 = vld [vmem:[%s1544_s30 + $0x7d8] sm:$0xff]  ;;  %v390_v38 = vld [vmem:[%s1544_s30 + $0x7e0] sm:$0xff] }
  0xc2   : > { %v875_v50 = vmul.f32 %v619_v39, %v363_v23  ;;  %v876_v51 = vmul.f32 %v620_v40, %v364_v24  ;;  %v624_v52 = vmul.f32 %v368_v36, %v368_v36  ;;  %1129 = vst [vmem:[%s1567_s17 + $0x6f8] sm:$0xff] %v873_v42  ;;  %v877_v56 = vmul.f32 %v621_v43, %v365_v29  ;;  %v391_v39 = vld [vmem:[%s1544_s30 + $0x7e8] sm:$0xff] }
  0xc3   : > { %v878_v57 = vmul.f32 %v622_v44, %v366_v30  ;;  %v879_v58 = vmul.f32 %v623_v45, %v367_v31  ;;  %v625_v59 = vmul.f32 %v369_v41, %v369_v41  ;;  %1130 = vst [vmem:[%s1567_s17 + $0x700] sm:$0xff] %v874_v49  ;;  %v626_v62 = vmul.f32 %v370_v46, %v370_v46  ;;  %v386_v30 = vld [vmem:[%s1544_s30 + $0x7c0] sm:$0xff]  ;;  %v387_v31 = vld [vmem:[%s1544_s30 + $0x7c8] sm:$0xff]  ;;  %v392_v44 = vld [vmem:[%s1544_s30 + $0x7f0] sm:$0xff] }
  0xc4   : > { %1131 = vst [vmem:[%s1567_s17 + $0x708] sm:$0xff] %v875_v50  ;;  %1132 = vst [vmem:[%s1567_s17 + $0x710] sm:$0xff] %v876_v51  ;;  %v880_v61 = vmul.f32 %v624_v52, %v368_v36  ;;  %v627_v63 = vmul.f32 %v371_v47, %v371_v47  ;;  %v628_v0 = vmul.f32 %v372_v48, %v372_v48  ;;  %v393_v49 = vld [vmem:[%s1544_s30 + $0x7f8] sm:$0xff] }
  0xc5   : > { %1133 = vst [vmem:[%s1567_s17 + $0x718] sm:$0xff] %v877_v56  ;;  %1134 = vst [vmem:[%s1567_s17 + $0x720] sm:$0xff] %v878_v57  ;;  %v881_v2 = vmul.f32 %v625_v59, %v369_v41  ;;  %v629_v3 = vmul.f32 %v373_v53, %v373_v53  ;;  %v630_v4 = vmul.f32 %v374_v54, %v374_v54 }
  0xc6   : > { %1135 = vst [vmem:[%s1567_s17 + $0x728] sm:$0xff] %v879_v58  ;;  %v631_v5 = vmul.f32 %v375_v55, %v375_v55  ;;  %1136 = vst [vmem:[%s1567_s17 + $0x730] sm:$0xff] %v880_v61  ;;  %v882_v9 = vmul.f32 %v626_v62, %v370_v46  ;;  %v883_v10 = vmul.f32 %v627_v63, %v371_v47 }
  0xc7   : > { %v884_v11 = vmul.f32 %v628_v0, %v372_v48  ;;  %v632_v12 = vmul.f32 %v376_v60, %v376_v60  ;;  %1137 = vst [vmem:[%s1567_s17 + $0x738] sm:$0xff] %v881_v2  ;;  %v885_v16 = vmul.f32 %v629_v3, %v373_v53  ;;  %v886_v17 = vmul.f32 %v630_v4, %v374_v54 }
  0xc8   : > { %v887_v18 = vmul.f32 %v631_v5, %v375_v55  ;;  %v633_v19 = vmul.f32 %v377_v1, %v377_v1  ;;  %1138 = vst [vmem:[%s1567_s17 + $0x740] sm:$0xff] %v882_v9  ;;  %1139 = vst [vmem:[%s1567_s17 + $0x748] sm:$0xff] %v883_v10  ;;  %v634_v22 = vmul.f32 %v378_v6, %v378_v6 }
  0xc9   : > { %1140 = vst [vmem:[%s1567_s17 + $0x750] sm:$0xff] %v884_v11  ;;  %v888_v21 = vmul.f32 %v632_v12, %v376_v60  ;;  %v635_v23 = vmul.f32 %v379_v7, %v379_v7  ;;  %v636_v24 = vmul.f32 %v380_v8, %v380_v8  ;;  %1141 = vst [vmem:[%s1567_s17 + $0x758] sm:$0xff] %v885_v16 }
  0xca   : > { %1142 = vst [vmem:[%s1567_s17 + $0x760] sm:$0xff] %v886_v17  ;;  %1143 = vst [vmem:[%s1567_s17 + $0x768] sm:$0xff] %v887_v18  ;;  %v889_v26 = vmul.f32 %v633_v19, %v377_v1  ;;  %v637_v27 = vmul.f32 %v381_v13, %v381_v13  ;;  %v638_v28 = vmul.f32 %v382_v14, %v382_v14 }
  0xcb   : > { %v639_v29 = vmul.f32 %v383_v15, %v383_v15  ;;  %1144 = vst [vmem:[%s1567_s17 + $0x770] sm:$0xff] %v888_v21  ;;  %v890_v33 = vmul.f32 %v634_v22, %v378_v6  ;;  %v891_v34 = vmul.f32 %v635_v23, %v379_v7  ;;  %v892_v35 = vmul.f32 %v636_v24, %v380_v8 }
  0xcc   : > { %v640_v36 = vmul.f32 %v384_v20, %v384_v20  ;;  %1145 = vst [vmem:[%s1567_s17 + $0x778] sm:$0xff] %v889_v26  ;;  %v893_v40 = vmul.f32 %v637_v27, %v381_v13  ;;  %v894_v41 = vmul.f32 %v638_v28, %v382_v14  ;;  %v641_v43 = vmul.f32 %v385_v25, %v385_v25 }
  0xcd   : > { %v895_v42 = vmul.f32 %v639_v29, %v383_v15  ;;  %1146 = vst [vmem:[%s1567_s17 + $0x780] sm:$0xff] %v890_v33  ;;  %1147 = vst [vmem:[%s1567_s17 + $0x788] sm:$0xff] %v891_v34  ;;  %v642_v46 = vmul.f32 %v386_v30, %v386_v30  ;;  %v643_v47 = vmul.f32 %v387_v31, %v387_v31 }
  0xce   : > { %1148 = vst [vmem:[%s1567_s17 + $0x790] sm:$0xff] %v892_v35  ;;  %v896_v45 = vmul.f32 %v640_v36, %v384_v20  ;;  %v644_v48 = vmul.f32 %v388_v32, %v388_v32  ;;  %1149 = vst [vmem:[%s1567_s17 + $0x798] sm:$0xff] %v893_v40  ;;  %v897_v50 = vmul.f32 %v641_v43, %v385_v25 }
  0xcf   : > { %1150 = vst [vmem:[%s1567_s17 + $0x7a0] sm:$0xff] %v894_v41  ;;  %1151 = vst [vmem:[%s1567_s17 + $0x7a8] sm:$0xff] %v895_v42  ;;  %v645_v51 = vmul.f32 %v389_v37, %v389_v37  ;;  %v646_v52 = vmul.f32 %v390_v38, %v390_v38  ;;  %v647_v53 = vmul.f32 %v391_v39, %v391_v39 }
  0xd0   : > { %1152 = vst [vmem:[%s1567_s17 + $0x7b0] sm:$0xff] %v896_v45  ;;  %v898_v54 = vmul.f32 %v642_v46, %v386_v30  ;;  %v899_v55 = vmul.f32 %v643_v47, %v387_v31  ;;  %v900_v56 = vmul.f32 %v644_v48, %v388_v32  ;;  %v648_v57 = vmul.f32 %v392_v44, %v392_v44 }
  0xd1   : > { %1153 = vst [vmem:[%s1567_s17 + $0x7b8] sm:$0xff] %v897_v50  ;;  %v901_v58 = vmul.f32 %v645_v51, %v389_v37  ;;  %v902_v59 = vmul.f32 %v646_v52, %v390_v38  ;;  %v903_v60 = vmul.f32 %v647_v53, %v391_v39  ;;  %v649_v61 = vmul.f32 %v393_v49, %v393_v49 }
  0xd2   : > { %1154 = vst [vmem:[%s1567_s17 + $0x7c0] sm:$0xff] %v898_v54  ;;  %1155 = vst [vmem:[%s1567_s17 + $0x7c8] sm:$0xff] %v899_v55  ;;  %v904_v62 = vmul.f32 %v648_v57, %v392_v44 }
  0xd3   : > { %1156 = vst [vmem:[%s1567_s17 + $0x7d0] sm:$0xff] %v900_v56  ;;  %1157 = vst [vmem:[%s1567_s17 + $0x7d8] sm:$0xff] %v901_v58  ;;  %v905_v63 = vmul.f32 %v649_v61, %v393_v49 }
  0xd4   : > { %1158 = vst [vmem:[%s1567_s17 + $0x7e0] sm:$0xff] %v902_v59  ;;  %1159 = vst [vmem:[%s1567_s17 + $0x7e8] sm:$0xff] %v903_v60 }
  0xd5   : > { %1160 = vst [vmem:[%s1567_s17 + $0x7f0] sm:$0xff] %v904_v62  ;;  %1161 = vst [vmem:[%s1567_s17 + $0x7f8] sm:$0xff] %v905_v63 }
  0xd6   : > { %1363 = shalt.err (!%p1360_p2)
}
  0xd7   : > { %s1364_s13 = scalar_lea.hbm %s2066_s29, 32768  ;;  %s1368_s20 = scalar_lea.hbm %s2118_s1, 65536 }
  0xd8   : > { %p1365_p4 = scmp.ne.s32.totalorder %s2066_s29, %s1364_s13  ;;  %p1369_p9 = scmp.lt.u32.totalorder %s2066_s29, %s2118_s1 }
  0xd9   : > { %p1370_p1 = scmp.lt.u32.totalorder %s1368_s20, %s1364_s13  ;;  %p1372_p6 = scmp.lt.u32.totalorder %s1364_s13, %s2066_s29 }
  0xda   : > { %p1366_p5 = pnand %p1365_p4, %p2125_p11 }
  0xdb   : > { %p1371_p3 = por %p1370_p1, %p1369_p9 }
  0xdc   : > { %p1367_p7 = pneg %p1366_p5 }
  0xdd   : > { %p1373_p12 = por %p1372_p6, %p1371_p3 }
  0xdf   : > { %p1374_p13 = pnand %p1373_p12, %p1367_p7 }
  0xe1   : > { %1377 = shalt.err (!%p1374_p13)
}
  0xe2   : > { %s1422_s24 = smov 512   ;;  %s1423_s26 = smov 32  }
  0xe3   : > { %1272 = dma.vmem_to_hbm [thread:$0]  (%p2125_p11), %s2068_s27, 32768, %s2066_s29, %s1163_s2, %s1422_s24, %s1422_s24, %s1423_s26  }
  0xe4 PF: > { %s1192_s30 = sand.u32 1, %s1404_s6   ;;  %p2126_p8 = scmp.ne.s32.totalorder %s2123_s19, 0 }
  0xe5   : > { %p2127_p10 = scmp.ge.s32.totalorder %s1416_s9, 2  ;;  %s1193_s17 = scalar_lea.sflag [#allocation4], %s1192_s30 }
  0xe7   : > { %p1279_p0 = pnand %p2127_p10, %p2126_p8 }
  0xe9   : > { %1399 = dma.done.wait (!%p1279_p0), %s1193_s17, 32768  }
  0xea   : > { %1401 = vsyncadd (!%p1279_p0), %s1193_s17, 4294934528  ;;  %p14_p2 = scmp.ge.s32.totalorder %s1459_s12, 4   ;;  %s2128_s6 = smov %s1408_s7 }
  0xeb   : > { %s2129_s7 = smov %s1412_s8  ;;  %s2130_s8 = smov %s1471_s15 }
  0xec   : > { %s2131_s9 = smov %s1459_s12  ;;  %16 = sbr.rel (!%p14_p2) target bundleno = 5 (0x5), region = 69 }
  0xf3   :  { %1198 = vsyncpa [#allocation3], 1 }
  0xf4   :  { %1200 = vsyncpa [#allocation3 + $0x1], 1 }
  0xf5   :  { %1201 = vsyncpa [#allocation4], 1 }
  0xf6   :  { %1203 = vsyncpa [#allocation4 + $0x1], 1 }

</bundles_post_ra>
